<compile_context>
chip_gen: v6e
topology: v6e:2x2x1
jax: 0.10.0
libtpu: 0.0.40
codegen_flags: <defaults>
</compile_context>

<pallas_src>
import jax
import jax.numpy as jnp
import numpy as np
from jax.experimental import pallas as pl
from jax.experimental.pallas import tpu as pltpu

# ----------------------- small synthetic configuration -----------------------
B = 2                       # batch (per image stream)
C = 3                       # image channels
H = W = 16                  # image spatial
P = 4                       # conv-stem patch size (kernel == stride)
S = (H // P) * (W // P)     # spatial tokens after the stem (16)
K_RAW = P * P * C           # im2col contraction dim (48)
K_PAD = 128                 # zero-padded contraction dim (lane aligned)
FEAT = 256                  # embedding dim (stand-in for resnet50's 2048)
HID = 512                   # regressor hidden dim (stand-in for 1024)
NPOSE = 24 * 6              # 144: 6D rotation per SMPL joint (faithful)
NSHAPE = 10
NCAM = 3
NSTATE = NPOSE + NSHAPE + NCAM   # 157
STATE_PAD = 256             # lane-dense packed [pose|shape|cam|zeros] state
N_ITER = 3                  # hardcoded to 3 in the reference forward()


def _vmem():
    return pl.BlockSpec(memory_space=pltpu.MemorySpace.VMEM)


# ---------------------------- single fused kernel -----------------------------
def fused_kernel(patch_ref, poolmix_ref, encw_ref, encb_ref,
                 state0_ref, w1x_ref, w1state_ref, b1_ref,
                 wdec2_ref, bdec2_ref, out_ref):
    # patch_ref:   [2B*S, K_PAD] f32 stacked [img0 ; img1] patches
    # poolmix_ref: [2B, 2B*S]    f32 constant: rows 0..B-1 = GAP of img0_i,
    #                            rows B..2B-1 = GAP of (img0_i + img1_i)/2
    # encw_ref:    [K_PAD, FEAT] bf16 (zero rows beyond K_RAW)
    # state0_ref:  [2B, STATE_PAD] f32 packed [pose|shape|cam|zeros] init state
    # w1x/w1state/wdec2: bf16 weights; b1/bdec2/encb: f32 biases
    # out_ref:     [2B, STATE_PAD] f32 final IEF state for [e0 ; e_avg] batch

    # --- encoder: conv-stem-as-matmul (bf16 MXU) + f32 bias + ReLU ------------
    h = jnp.dot(patch_ref[...].astype(jnp.bfloat16), encw_ref[...],
                preferred_element_type=jnp.float32)          # [2B*S, FEAT]
    h = jnp.maximum(h + encb_ref[...], 0.0)                  # f32 VPU work only

    # --- fused global-average-pool + [e0 ; (e0+e1)/2] mixing (one matmul) ----
    x = jnp.dot(poolmix_ref[...], h,
                preferred_element_type=jnp.float32)          # [2B, FEAT]

    # --- IEF regressor; fc2 folded into decoder, dropout = identity at eval --
    state = state0_ref[...]                                  # f32 accumulator
    w1state = w1state_ref[...]
    wdec2 = wdec2_ref[...]
    bdec2 = bdec2_ref[...]
    # x part of fc1 (and its bias) is loop-invariant: hoist out of the loop
    xw = jnp.dot(x.astype(jnp.bfloat16), w1x_ref[...],
                 preferred_element_type=jnp.float32) + b1_ref[...]
    for _ in range(N_ITER):
        h1 = xw + jnp.dot(state.astype(jnp.bfloat16), w1state,
                          preferred_element_type=jnp.float32)
        state = state + jnp.dot(h1.astype(jnp.bfloat16), wdec2,
                                preferred_element_type=jnp.float32) + bdec2
    out_ref[...] = state


# -------------------------------- JAX glue ------------------------------------
def _patchify(imgs_nchw):
    """NCHW images -> [n_imgs*S, K_PAD] zero-padded patch matrix."""
    x = jnp.transpose(imgs_nchw, (0, 2, 3, 1))                    # NCHW -> NHWC
    n, hh, ww, cc = x.shape
    x = x.reshape(n, hh // P, P, ww // P, P, cc)
    x = jnp.transpose(x, (0, 1, 3, 2, 4, 5))                      # [n, Hp, Wp, P, P, C]
    patches = x.reshape(n * (hh // P) * (ww // P), P * P * cc)    # [n*S, K_RAW]
    return jnp.pad(patches, ((0, 0), (0, K_PAD - K_RAW)))         # -> [n*S, K_PAD]


def _pool_mix(bb):
    """Constant [2B, 2B*S] pooling+mixing matrix (built at trace time)."""
    m = np.zeros((2 * bb, 2 * bb * S), np.float32)
    for i in range(bb):
        m[i, i * S:(i + 1) * S] = 1.0 / S                         # e0_i = GAP(img0_i)
        m[bb + i, i * S:(i + 1) * S] = 0.5 / S                    # (e0_i + e1_i)/2
        m[bb + i, (bb + i) * S:(bb + i + 1) * S] = 0.5 / S
    return jnp.asarray(m)


def rot6d_to_rotmat(x):
    """x: [N, 144] (6D rotations) -> [N, 24, 3, 3] via Gram-Schmidt."""
    n = x.shape[0]
    x = x.reshape(-1, 3, 2)
    a1 = x[:, :, 0]
    a2 = x[:, :, 1]
    b1 = a1 / jnp.maximum(jnp.linalg.norm(a1, axis=1, keepdims=True), 1e-8)
    proj = jnp.sum(b1 * a2, axis=1, keepdims=True)
    b2u = a2 - proj * b1
    b2 = b2u / jnp.maximum(jnp.linalg.norm(b2u, axis=1, keepdims=True), 1e-8)
    b3 = jnp.cross(b1, b2)
    rot = jnp.stack([b1, b2, b3], axis=-1)                        # [N*24, 3, 3]
    return rot.reshape(n, 24, 3, 3)


def emb_avg_forward(params, img0, img1,
                    init_pose=None, init_shape=None, init_cam=None):
    bb = img0.shape[0]

    def stacked_init(v, default, width):
        # Build the init directly at the stacked [e0 ; e_avg] batch size 2B
        # (broadcast instead of concatenate([state0, state0])).
        if v is None:
            v = default
        v = jnp.asarray(v, jnp.float32).reshape(-1, width)
        if v.shape[0] == 1:
            return jnp.broadcast_to(v, (2 * bb, width))
        return jnp.concatenate([v, v], axis=0)

    pose2 = stacked_init(init_pose, params["mean_pose"], NPOSE)
    shape2 = stacked_init(init_shape, params["mean_shape"], NSHAPE)
    cam2 = stacked_init(init_cam, params["mean_cam"], NCAM)
    # Packed lane-dense IEF state: [pose | shape | cam | zeros] -> 256 lanes.
    state0 = jnp.concatenate(
        [pose2, shape2, cam2,
         jnp.zeros((2 * bb, STATE_PAD - NSTATE), jnp.float32)], axis=1)

    patches = _patchify(jnp.concatenate([img0, img1], axis=0))    # [2B*S, K_PAD]
    poolmix = _pool_mix(bb)                                       # [2B, 2B*S]

    # --- ONE fused pallas_call: encoder + GAP/mix + IEF regressor ------------
    state = pl.pallas_call(
        fused_kernel,
        out_shape=jax.ShapeDtypeStruct((2 * bb, STATE_PAD), jnp.float32),
        in_specs=[_vmem()] * 10,
        out_specs=_vmem(),
    )(patches, poolmix,
      params["enc_w"], params["enc_b"], state0,
      params["w1x"], params["w1state"], params["b1"],
      params["wdec2"], params["bdec2"])                           # [2B, 256]

    pose_all = state[:, :NPOSE]
    rotmat_all = rot6d_to_rotmat(pose_all)                        # [2B, 24, 3, 3]
    rotmat0, rotmat_avg = rotmat_all[:bb], rotmat_all[bb:]
    betas_avg = state[bb:, NPOSE:NPOSE + NSHAPE]
    camera0 = state[:bb, NPOSE + NSHAPE:NSTATE]

    pred_rotmat_final = jnp.concatenate([rotmat0[:, 0:1], rotmat_avg[:, 1:]],
                                        axis=1)
    pred_betas_final = betas_avg
    pred_camera_final = camera0
    return pred_rotmat_final, pred_betas_final, pred_camera_final


# ----------------------------- deterministic init -----------------------------
def init_params(key):
    ks = jax.random.split(key, 12)
    s = 0.02

    def padded(a, shape):
        out = jnp.zeros(shape, jnp.float32)
        return out.at[:a.shape[0], :a.shape[1]].set(a)

    enc_w = jax.random.normal(ks[0], (K_RAW, FEAT), jnp.float32) * s
    # fc1 weight split over [x | pose | shape | cam]; state part packed/padded.
    w1p = jax.random.normal(ks[2], (NPOSE, HID), jnp.float32) * s
    w1s = jax.random.normal(ks[3], (NSHAPE, HID), jnp.float32) * s
    w1c = jax.random.normal(ks[4], (NCAM, HID), jnp.float32) * s
    w2 = jax.random.normal(ks[5], (HID, HID), jnp.float32) * s
    # decoders packed into one lane-dense [HID, 256] weight (zero pad columns).
    wp = jax.random.normal(ks[6], (HID, NPOSE), jnp.float32) * s
    ws = jax.random.normal(ks[7], (HID, NSHAPE), jnp.float32) * s
    wc = jax.random.normal(ks[8], (HID, NCAM), jnp.float32) * s

    wdec = padded(jnp.concatenate([wp, ws, wc], axis=1), (HID, STATE_PAD))
    b2 = jnp.zeros((1, HID), jnp.float32)
    bdec = jnp.zeros((1, STATE_PAD), jnp.float32)
    # Exact offline fold of fc2 into the decoder (no nonlinearity between them):
    #   state += ((h1 @ w2 + b2) @ wdec + bdec)  ==  h1 @ wdec2 + bdec2
    wdec2 = jnp.dot(w2, wdec)
    bdec2 = jnp.dot(b2, wdec) + bdec

    params = {
        # matmul weights stored / DMA'd as bf16; biases & mean params stay f32
        "enc_w": padded(enc_w, (K_PAD, FEAT)).astype(jnp.bfloat16),
        "enc_b": jnp.zeros((1, FEAT), jnp.float32),
        "w1x": (jax.random.normal(ks[1], (FEAT, HID), jnp.float32) * s
                ).astype(jnp.bfloat16),
        "w1state": padded(jnp.concatenate([w1p, w1s, w1c], axis=0),
                          (STATE_PAD, HID)).astype(jnp.bfloat16),
        "b1": jnp.zeros((1, HID), jnp.float32),
        "wdec2": wdec2.astype(jnp.bfloat16),
        "bdec2": bdec2,
        # SMPL mean params (stand-in, deterministic)
        "mean_pose": jax.random.normal(ks[9], (1, NPOSE), jnp.float32) * 0.1,
        "mean_shape": jax.random.normal(ks[10], (1, NSHAPE), jnp.float32) * 0.1,
        "mean_cam": jnp.array([[0.9, 0.0, 0.0]], jnp.float32),
    }
    return params


if __name__ == "__main__":
    key = jax.random.PRNGKey(0)
    kp, k0, k1 = jax.random.split(key, 3)
    params = init_params(kp)
    img0 = jax.random.normal(k0, (B, C, H, W), jnp.float32)
    img1 = jax.random.normal(k1, (B, C, H, W), jnp.float32)

    fwd = jax.jit(emb_avg_forward)
    rotmat, betas, cam = fwd(params, img0, img1)
    jax.block_until_ready((rotmat, betas, cam))

    assert rotmat.shape == (B, 24, 3, 3)
    assert betas.shape == (B, NSHAPE)
    assert cam.shape == (B, NCAM)
    print("KERNEL_OK")
</pallas_src>

<mosaic_0001>
module attributes {stable_mosaic.version = 11 : i64} {
  func.func @fused_kernel(%arg0: memref<64x128xf32, #tpu.memory_space<vmem>>, %arg1: memref<4x64xf32, #tpu.memory_space<vmem>>, %arg2: memref<128x256xbf16, #tpu.memory_space<vmem>>, %arg3: memref<1x256xf32, #tpu.memory_space<vmem>>, %arg4: memref<4x256xf32, #tpu.memory_space<vmem>>, %arg5: memref<256x512xbf16, #tpu.memory_space<vmem>>, %arg6: memref<256x512xbf16, #tpu.memory_space<vmem>>, %arg7: memref<1x512xf32, #tpu.memory_space<vmem>>, %arg8: memref<512x256xbf16, #tpu.memory_space<vmem>>, %arg9: memref<1x256xf32, #tpu.memory_space<vmem>>, %arg10: memref<4x256xf32, #tpu.memory_space<vmem>>) attributes {dimension_semantics = [], scalar_prefetch = 0 : i64, scratch_operands = 0 : i64, tpu.core_type = #tpu.core_type<tc>} {
    %c0 = arith.constant 0 : index
    %c0_0 = arith.constant 0 : index
    %0 = vector.load %arg0[%c0, %c0_0] : memref<64x128xf32, #tpu.memory_space<vmem>>, vector<64x128xf32>
    %1 = arith.truncf %0 : vector<64x128xf32> to vector<64x128xbf16>
    %c0_1 = arith.constant 0 : index
    %c0_2 = arith.constant 0 : index
    %2 = vector.load %arg2[%c0_1, %c0_2] : memref<128x256xbf16, #tpu.memory_space<vmem>>, vector<128x256xbf16>
    %cst = arith.constant dense<0.000000e+00> : vector<64x256xf32>
    %3 = tpu.matmul %1, %2, %cst {dimension_numbers = #tpu.dot_dimension_numbers<[1], [0], [0], [1], [0, 0, 1, 1], [], []>} : vector<64x128xbf16>, vector<128x256xbf16>, vector<64x256xf32> -> vector<64x256xf32>
    %c0_3 = arith.constant 0 : index
    %c0_4 = arith.constant 0 : index
    %4 = vector.load %arg3[%c0_3, %c0_4] : memref<1x256xf32, #tpu.memory_space<vmem>>, vector<1x256xf32>
    %5 = vector.broadcast %4 : vector<1x256xf32> to vector<64x256xf32>
    %6 = arith.addf %3, %5 : vector<64x256xf32>
    %cst_5 = arith.constant 0.000000e+00 : f32
    %7 = vector.broadcast %cst_5 : f32 to vector<64x256xf32>
    %8 = arith.maximumf %6, %7 : vector<64x256xf32>
    %c0_6 = arith.constant 0 : index
    %c0_7 = arith.constant 0 : index
    %9 = vector.load %arg1[%c0_6, %c0_7] : memref<4x64xf32, #tpu.memory_space<vmem>>, vector<4x64xf32>
    %cst_8 = arith.constant dense<0.000000e+00> : vector<4x256xf32>
    %10 = tpu.matmul %9, %8, %cst_8 {dimension_numbers = #tpu.dot_dimension_numbers<[1], [0], [0], [1], [0, 0, 1, 1], [], []>} : vector<4x64xf32>, vector<64x256xf32>, vector<4x256xf32> -> vector<4x256xf32>
    %c0_9 = arith.constant 0 : index
    %c0_10 = arith.constant 0 : index
    %11 = vector.load %arg4[%c0_9, %c0_10] : memref<4x256xf32, #tpu.memory_space<vmem>>, vector<4x256xf32>
    %c0_11 = arith.constant 0 : index
    %c0_12 = arith.constant 0 : index
    %12 = vector.load %arg6[%c0_11, %c0_12] : memref<256x512xbf16, #tpu.memory_space<vmem>>, vector<256x512xbf16>
    %c0_13 = arith.constant 0 : index
    %c0_14 = arith.constant 0 : index
    %13 = vector.load %arg8[%c0_13, %c0_14] : memref<512x256xbf16, #tpu.memory_space<vmem>>, vector<512x256xbf16>
    %c0_15 = arith.constant 0 : index
    %c0_16 = arith.constant 0 : index
    %14 = vector.load %arg9[%c0_15, %c0_16] : memref<1x256xf32, #tpu.memory_space<vmem>>, vector<1x256xf32>
    %15 = arith.truncf %10 : vector<4x256xf32> to vector<4x256xbf16>
    %c0_17 = arith.constant 0 : index
    %c0_18 = arith.constant 0 : index
    %16 = vector.load %arg5[%c0_17, %c0_18] : memref<256x512xbf16, #tpu.memory_space<vmem>>, vector<256x512xbf16>
    %cst_19 = arith.constant dense<0.000000e+00> : vector<4x512xf32>
    %17 = tpu.matmul %15, %16, %cst_19 {dimension_numbers = #tpu.dot_dimension_numbers<[1], [0], [0], [1], [0, 0, 1, 1], [], []>} : vector<4x256xbf16>, vector<256x512xbf16>, vector<4x512xf32> -> vector<4x512xf32>
    %c0_20 = arith.constant 0 : index
    %c0_21 = arith.constant 0 : index
    %18 = vector.load %arg7[%c0_20, %c0_21] : memref<1x512xf32, #tpu.memory_space<vmem>>, vector<1x512xf32>
    %19 = vector.broadcast %18 : vector<1x512xf32> to vector<4x512xf32>
    %20 = arith.addf %17, %19 : vector<4x512xf32>
    %21 = arith.truncf %11 : vector<4x256xf32> to vector<4x256xbf16>
    %cst_22 = arith.constant dense<0.000000e+00> : vector<4x512xf32>
    %22 = tpu.matmul %21, %12, %cst_22 {dimension_numbers = #tpu.dot_dimension_numbers<[1], [0], [0], [1], [0, 0, 1, 1], [], []>} : vector<4x256xbf16>, vector<256x512xbf16>, vector<4x512xf32> -> vector<4x512xf32>
    %23 = arith.addf %20, %22 : vector<4x512xf32>
    %24 = arith.truncf %23 : vector<4x512xf32> to vector<4x512xbf16>
    %cst_23 = arith.constant dense<0.000000e+00> : vector<4x256xf32>
    %25 = tpu.matmul %24, %13, %cst_23 {dimension_numbers = #tpu.dot_dimension_numbers<[1], [0], [0], [1], [0, 0, 1, 1], [], []>} : vector<4x512xbf16>, vector<512x256xbf16>, vector<4x256xf32> -> vector<4x256xf32>
    %26 = arith.addf %11, %25 : vector<4x256xf32>
    %27 = vector.broadcast %14 : vector<1x256xf32> to vector<4x256xf32>
    %28 = arith.addf %26, %27 : vector<4x256xf32>
    %29 = arith.truncf %28 : vector<4x256xf32> to vector<4x256xbf16>
    %cst_24 = arith.constant dense<0.000000e+00> : vector<4x512xf32>
    %30 = tpu.matmul %29, %12, %cst_24 {dimension_numbers = #tpu.dot_dimension_numbers<[1], [0], [0], [1], [0, 0, 1, 1], [], []>} : vector<4x256xbf16>, vector<256x512xbf16>, vector<4x512xf32> -> vector<4x512xf32>
    %31 = arith.addf %20, %30 : vector<4x512xf32>
    %32 = arith.truncf %31 : vector<4x512xf32> to vector<4x512xbf16>
    %cst_25 = arith.constant dense<0.000000e+00> : vector<4x256xf32>
    %33 = tpu.matmul %32, %13, %cst_25 {dimension_numbers = #tpu.dot_dimension_numbers<[1], [0], [0], [1], [0, 0, 1, 1], [], []>} : vector<4x512xbf16>, vector<512x256xbf16>, vector<4x256xf32> -> vector<4x256xf32>
    %34 = arith.addf %28, %33 : vector<4x256xf32>
    %35 = vector.broadcast %14 : vector<1x256xf32> to vector<4x256xf32>
    %36 = arith.addf %34, %35 : vector<4x256xf32>
    %37 = arith.truncf %36 : vector<4x256xf32> to vector<4x256xbf16>
    %cst_26 = arith.constant dense<0.000000e+00> : vector<4x512xf32>
    %38 = tpu.matmul %37, %12, %cst_26 {dimension_numbers = #tpu.dot_dimension_numbers<[1], [0], [0], [1], [0, 0, 1, 1], [], []>} : vector<4x256xbf16>, vector<256x512xbf16>, vector<4x512xf32> -> vector<4x512xf32>
    %39 = arith.addf %20, %38 : vector<4x512xf32>
    %40 = arith.truncf %39 : vector<4x512xf32> to vector<4x512xbf16>
    %cst_27 = arith.constant dense<0.000000e+00> : vector<4x256xf32>
    %41 = tpu.matmul %40, %13, %cst_27 {dimension_numbers = #tpu.dot_dimension_numbers<[1], [0], [0], [1], [0, 0, 1, 1], [], []>} : vector<4x512xbf16>, vector<512x256xbf16>, vector<4x256xf32> -> vector<4x256xf32>
    %42 = arith.addf %36, %41 : vector<4x256xf32>
    %43 = vector.broadcast %14 : vector<1x256xf32> to vector<4x256xf32>
    %44 = arith.addf %42, %43 : vector<4x256xf32>
    %c0_28 = arith.constant 0 : index
    %c0_29 = arith.constant 0 : index
    %45 = vector.load %arg10[%c0_28, %c0_29] : memref<4x256xf32, #tpu.memory_space<vmem>>, vector<4x256xf32>
    tpu.vector_store %arg10[%c0_28, %c0_29], %44 {strides = array<i32>} : memref<4x256xf32, #tpu.memory_space<vmem>>, vector<4x256xf32>,
    return
  }
}

</mosaic_0001>

<bundles_post_ra>
// kernel: emb_avg_forward.1
= control target key start
LH: loop header
LB: loop body
LE: loop exit
PB: predicated region body
PF: predicated region fallthrough
CT: control target
= control target key end

     0   :  { %v2698_v1 = vmov 0   ;;  %v2699_v29 = vmov 0.0   ;;  %vm246_vm0 = vcmask 523264   ;;  %s4179_s2 = inlined_call_operand.vmem [shape: bf16[128,256], index: 2, kind: input, shape index: {}]   ;;  %s4180_s0 = inlined_call_operand.vmem [shape: f32[64,128], index: 0, kind: input, shape index: {}]   ;;  %s4181_s5 = inlined_call_operand.vmem [shape: bf16[256,512], index: 5, kind: input, shape index: {}]   ;;  %s4182_s3 = inlined_call_operand.vmem [shape: f32[1,256], index: 3, kind: input, shape index: {}]   ;;  %s4183_s1 = inlined_call_operand.vmem [shape: f32[4,64], index: 1, kind: input, shape index: {}]   ;;  %s4184_s6 = inlined_call_operand.vmem [shape: bf16[256,512], index: 6, kind: input, shape index: {}]   ;;  %s4185_s4 = inlined_call_operand.vmem [shape: f32[4,256], index: 4, kind: input, shape index: {}]   ;;  %s4186_s8 = inlined_call_operand.vmem [shape: bf16[512,256], index: 8, kind: input, shape index: {}]   ;;  %s4187_s7 = inlined_call_operand.vmem [shape: f32[1,512], index: 7, kind: input, shape index: {}]   ;;  %s4188_s9 = inlined_call_operand.vmem [shape: f32[1,256], index: 9, kind: input, shape index: {}]   ;;  %s4189_s10 = inlined_call_operand.vmem [shape: f32[4,256], index: 10, kind: output, shape index: {}]  }
   0x1   :  { %v2357_v0 = vld [vmem:[%s4179_s2 + $0x74] ss:$8 sps:$4 sm:$0xff]   ;;  %188 = vmatprep.mubr.bf16.mxu0 %v2698_v1  ;;  %v2359_v2 = vld [vmem:[%s4179_s2 + $0x70] ss:$8 sps:$4 sm:$0xff]   ;;  %v2360_v3 = vld [vmem:[%s4179_s2 + $0x64] ss:$8 sps:$4 sm:$0xff]   ;;  %314 = vmatprep.mubr.f32.mxu1 %v2699_v29 }
   0x2   :  { %156 = vmatprep.subr.bf16.mxu0 %v2357_v0  ;;  %v2362_v4 = vld [vmem:[%s4179_s2 + $0x60] ss:$8 sps:$4 sm:$0xff]   ;;  %v2363_v5 = vld [vmem:[%s4179_s2 + $0x54] ss:$8 sps:$4 sm:$0xff]   ;;  %v2365_v6 = vld [vmem:[%s4179_s2 + $0x50] ss:$8 sps:$4 sm:$0xff]  }
   0x3   :  { %157 = vmatpush1.bf16.msra.mxu0 %v2359_v2  ;;  %v2366_v7 = vld [vmem:[%s4179_s2 + $0x44] ss:$8 sps:$4 sm:$0xff]   ;;  %v2368_v8 = vld [vmem:[%s4179_s2 + $0x40] ss:$8 sps:$4 sm:$0xff]   ;;  %v2369_v9 = vld [vmem:[%s4179_s2 + $0x34] ss:$8 sps:$4 sm:$0xff]  }
   0x4   :  { %158 = vmatprep.subr.bf16.mxu0 %v2360_v3  ;;  %v2371_v10 = vld [vmem:[%s4179_s2 + $0x30] ss:$8 sps:$4 sm:$0xff]   ;;  %v2372_v11 = vld [vmem:[%s4179_s2 + $0x24] ss:$8 sps:$4 sm:$0xff]   ;;  %v2374_v12 = vld [vmem:[%s4179_s2 + $0x20] ss:$8 sps:$4 sm:$0xff]  }
   0x5   :  { %v2375_v13 = vld [vmem:[%s4179_s2 + $0x14] ss:$8 sps:$4 sm:$0xff]   ;;  %v2377_v14 = vld [vmem:[%s4179_s2 + $0x10] ss:$8 sps:$4 sm:$0xff]   ;;  %v2378_v15 = vld [vmem:[%s4179_s2 + $0x4] ss:$8 sps:$4 sm:$0xff]  }
   0x6   :  { %v2380_v16 = vld [vmem:[%s4179_s2] ss:$8 sps:$4 sm:$0xff]   ;;  %v38_v20 = vld [vmem:[%s4180_s0 + $0x10] sm:$0xff]  ;;  %v39_v21 = vld [vmem:[%s4180_s0 + $0x18] sm:$0xff] }
   0x7   :  { %159 = vmatpush1.bf16.msra.mxu0 %v2362_v4  ;;  %v36_v17 = vld [vmem:[%s4180_s0] sm:$0xff]  ;;  %v37_v18 = vld [vmem:[%s4180_s0 + $0x8] sm:$0xff]  ;;  %v45_v22 = vpack.c.bf16 %v39_v21, %v38_v20  ;;  %v42_v26 = vld [vmem:[%s4180_s0 + $0x30] sm:$0xff]  ;;  %v66_v4 = vlaneseq }
   0x8   :  { %160 = vmatprep.subr.bf16.mxu0 %v2363_v5  ;;  %v44_v19 = vpack.c.bf16 %v37_v18, %v36_v17  ;;  %v40_v23 = vld [vmem:[%s4180_s0 + $0x20] sm:$0xff]  ;;  %v41_v24 = vld [vmem:[%s4180_s0 + $0x28] sm:$0xff]  ;;  %v43_v27 = vld [vmem:[%s4180_s0 + $0x38] sm:$0xff] }
   0x9   :  { %v46_v25 = vpack.c.bf16 %v41_v24, %v40_v23  ;;  %v47_v28 = vpack.c.bf16 %v43_v27, %v42_v26  ;;  %v2384_v30 = vld [vmem:[%s4181_s5 + $0xe8] ss:$16 sps:$4 sm:$0xff]   ;;  %v2386_v31 = vld [vmem:[%s4181_s5 + $0xec] ss:$16 sps:$4 sm:$0xff]  }
   0xa   :  { %v2390_v32 = vld [vmem:[%s4181_s5 + $0xc8] ss:$16 sps:$4 sm:$0xff]   ;;  %v2392_v33 = vld [vmem:[%s4181_s5 + $0xcc] ss:$16 sps:$4 sm:$0xff]  }
   0xb   :  { %161 = vmatpush1.bf16.msra.mxu0 %v2365_v6  ;;  %v2398_v34 = vld [vmem:[%s4181_s5 + $0xac] ss:$16 sps:$4 sm:$0xff]   ;;  %v2396_v35 = vld [vmem:[%s4181_s5 + $0xa8] ss:$16 sps:$4 sm:$0xff]  }
   0xc   :  { %162 = vmatprep.subr.bf16.mxu0 %v2366_v7  ;;  %v2404_v36 = vld [vmem:[%s4181_s5 + $0x8c] ss:$16 sps:$4 sm:$0xff]   ;;  %v2402_v37 = vld [vmem:[%s4181_s5 + $0x88] ss:$16 sps:$4 sm:$0xff]   ;;  %v2917_v7 = vshrl.u32 %v66_v4, 7 }
   0xd   :  { %v2410_v38 = vld [vmem:[%s4181_s5 + $0x6c] ss:$16 sps:$4 sm:$0xff]   ;;  %v2408_v39 = vld [vmem:[%s4181_s5 + $0x68] ss:$16 sps:$4 sm:$0xff]   ;;  %v2431_v4 = vld [vmem:[%s4181_s5 + $0x1e4] ss:$16 sps:$4 sm:$0xff]  }
   0xe   :  { %v2416_v40 = vld [vmem:[%s4181_s5 + $0x4c] ss:$16 sps:$4 sm:$0xff]   ;;  %v2414_v41 = vld [vmem:[%s4181_s5 + $0x48] ss:$16 sps:$4 sm:$0xff]  }
   0xf   :  { %163 = vmatpush1.bf16.msra.mxu0 %v2368_v8  ;;  %v2422_v42 = vld [vmem:[%s4181_s5 + $0x2c] ss:$16 sps:$4 sm:$0xff]   ;;  %v2420_v43 = vld [vmem:[%s4181_s5 + $0x28] ss:$16 sps:$4 sm:$0xff]  }
  0x10   :  { %164 = vmatprep.subr.bf16.mxu0 %v2369_v9  ;;  %v2428_v44 = vld [vmem:[%s4181_s5 + $0xc] ss:$16 sps:$4 sm:$0xff]   ;;  %v2426_v45 = vld [vmem:[%s4181_s5 + $0x8] ss:$16 sps:$4 sm:$0xff]  }
  0x11   :  { %v2434_v46 = vld [vmem:[%s4181_s5 + $0x1ec] ss:$16 sps:$4 sm:$0xff]   ;;  %v2432_v47 = vld [vmem:[%s4181_s5 + $0x1e8] ss:$16 sps:$4 sm:$0xff]  }
  0x12   :  { %v2440_v48 = vld [vmem:[%s4181_s5 + $0x1cc] ss:$16 sps:$4 sm:$0xff]   ;;  %v2438_v49 = vld [vmem:[%s4181_s5 + $0x1c8] ss:$16 sps:$4 sm:$0xff]  }
  0x13   :  { %165 = vmatpush1.bf16.msra.mxu0 %v2371_v10  ;;  %v2446_v50 = vld [vmem:[%s4181_s5 + $0x1ac] ss:$16 sps:$4 sm:$0xff]   ;;  %v2444_v51 = vld [vmem:[%s4181_s5 + $0x1a8] ss:$16 sps:$4 sm:$0xff]   ;;  %v2920_v10 = vsub.s32 0, %v2917_v7 }
  0x14   :  { %166 = vmatprep.subr.bf16.mxu0 %v2372_v11  ;;  %v2452_v52 = vld [vmem:[%s4181_s5 + $0x18c] ss:$16 sps:$4 sm:$0xff]   ;;  %v2450_v53 = vld [vmem:[%s4181_s5 + $0x188] ss:$16 sps:$4 sm:$0xff]  }
  0x15   :  { %v2458_v54 = vld [vmem:[%s4181_s5 + $0x16c] ss:$16 sps:$4 sm:$0xff]   ;;  %v2456_v55 = vld [vmem:[%s4181_s5 + $0x168] ss:$16 sps:$4 sm:$0xff]   ;;  %4361 = vst [vmem:[#allocation2_spill] sm:$0xff] %v2920_v10 }
  0x16   :  { %v2464_v56 = vld [vmem:[%s4181_s5 + $0x14c] ss:$16 sps:$4 sm:$0xff]   ;;  %v2462_v57 = vld [vmem:[%s4181_s5 + $0x148] ss:$16 sps:$4 sm:$0xff]  }
  0x17   :  { %167 = vmatpush1.bf16.msra.mxu0 %v2374_v12  ;;  %v2470_v58 = vld [vmem:[%s4181_s5 + $0x12c] ss:$16 sps:$4 sm:$0xff]   ;;  %v2468_v59 = vld [vmem:[%s4181_s5 + $0x128] ss:$16 sps:$4 sm:$0xff]   ;;  %v64_v12 = vld [vmem:[%s4182_s3] sm:$0x3] }
  0x18   :  { %168 = vmatprep.subr.bf16.mxu0 %v2375_v13  ;;  %v2926_v13 = vsub.s32 1, %v2917_v7 }
  0x1a   :  { %4362 = vst [vmem:[#allocation3_spill] sm:$0xff] %v2926_v13  ;;  %v73_v17 = vrot.slane %v64_v12, %v2926_v13 }
  0x1b   :  { %169 = vmatpush1.bf16.msra.mxu0 %v2377_v14 }
  0x1c   :  { %170 = vmatprep.subr.bf16.mxu0 %v2378_v15  ;;  %v69_v15 = vrot.slane %v64_v12, %v2920_v10  ;;  %v2449_v12 = vld [vmem:[%s4181_s5 + $0x184] ss:$16 sps:$4 sm:$0xff]  }
  0x1f   :  { %171 = vmatpush1.bf16.msra.mxu0 %v2380_v16 }
  0x20   :  { %900 = vmatprep.subr.bf16.mxu0 %v2386_v31 }
  0x22   :  { %189 = vmatmul.mubr.bf16.vlgmr.msra.gmra.mxu0 %v44_v19 }
  0x23   :  { %198 = vmatprep.mubr.bf16.mxu0 %v2698_v1  ;;  %901 = vmatpush1.bf16.msra.mxu0 %v2384_v30 }
  0x24   :  { %902 = vmatprep.subr.bf16.mxu0 %v2392_v33 }
  0x27   :  { %903 = vmatpush1.bf16.msra.mxu0 %v2390_v32 }
  0x28   :  { %904 = vmatprep.subr.bf16.mxu0 %v2398_v34 }
  0x2a   :  { %199 = vmatmul.mubr.bf16.gmra.mxu0 %v45_v22 }
  0x2b   :  { %208 = vmatprep.mubr.bf16.mxu0 %v2698_v1  ;;  %905 = vmatpush1.bf16.msra.mxu0 %v2396_v35 }
  0x2c   :  { %906 = vmatprep.subr.bf16.mxu0 %v2404_v36 }
  0x2f   :  { %907 = vmatpush1.bf16.msra.mxu0 %v2402_v37 }
  0x30   :  { %908 = vmatprep.subr.bf16.mxu0 %v2410_v38 }
  0x32   :  { %209 = vmatmul.mubr.bf16.gmra.mxu0 %v46_v25 }
  0x33   :  { %218 = vmatprep.mubr.bf16.mxu0 %v2698_v1  ;;  %909 = vmatpush1.bf16.msra.mxu0 %v2408_v39 }
  0x34   :  { %910 = vmatprep.subr.bf16.mxu0 %v2416_v40 }
  0x37   :  { %911 = vmatpush1.bf16.msra.mxu0 %v2414_v41 }
  0x38   :  { %912 = vmatprep.subr.bf16.mxu0 %v2422_v42 }
  0x3a   :  { %219 = vmatmul.mubr.bf16.gmra.mxu0 %v47_v28 }
  0x3b   :  { %913 = vmatpush1.bf16.msra.mxu0 %v2420_v43 }
  0x3c   :  { %914 = vmatprep.subr.bf16.mxu0 %v2428_v44 }
  0x3f   :  { %915 = vmatpush1.bf16.msra.mxu0 %v2426_v45 }
  0x40   :  { %916 = vmatprep.subr.bf16.mxu0 %v2434_v46 }
  0x43   :  { %917 = vmatpush2.bf16.msra.mxu0 %v2432_v47 }
  0x44   :  { %918 = vmatprep.subr.bf16.mxu0 %v2440_v48 }
  0x47   :  { %919 = vmatpush2.bf16.msra.mxu0 %v2438_v49 }
  0x48   :  { %920 = vmatprep.subr.bf16.mxu0 %v2446_v50  ;;  %v2383_v50 = vld [vmem:[%s4181_s5 + $0xe4] ss:$16 sps:$4 sm:$0xff]  }
  0x4b   :  { %921 = vmatpush2.bf16.msra.mxu0 %v2444_v51 }
  0x4c   :  { %922 = vmatprep.subr.bf16.mxu0 %v2452_v52  ;;  %v245_v52 = vld [vmem:[%s4183_s1] sm:$0xf] }
  0x4f   :  { %923 = vmatpush2.bf16.msra.mxu0 %v2450_v53  ;;  %v2381_v53 = vld [vmem:[%s4181_s5 + $0xe0] ss:$16 sps:$4 sm:$0xff]  }
  0x50   :  { %924 = vmatprep.subr.bf16.mxu0 %v2458_v54  ;;  %v2389_v54 = vld [vmem:[%s4181_s5 + $0xc4] ss:$16 sps:$4 sm:$0xff]  }
  0x53   :  { %925 = vmatpush2.bf16.msra.mxu0 %v2456_v55  ;;  %v2387_v55 = vld [vmem:[%s4181_s5 + $0xc0] ss:$16 sps:$4 sm:$0xff]  }
  0x54   :  { %926 = vmatprep.subr.bf16.mxu0 %v2464_v56  ;;  %v2395_v56 = vld [vmem:[%s4181_s5 + $0xa4] ss:$16 sps:$4 sm:$0xff]  }
  0x57   :  { %927 = vmatpush2.bf16.msra.mxu0 %v2462_v57  ;;  %v2393_v57 = vld [vmem:[%s4181_s5 + $0xa0] ss:$16 sps:$4 sm:$0xff]  }
  0x58   :  { %928 = vmatprep.subr.bf16.mxu0 %v2470_v58  ;;  %v2401_v58 = vld [vmem:[%s4181_s5 + $0x84] ss:$16 sps:$4 sm:$0xff]  }
  0x5b   :  { %929 = vmatpush2.bf16.msra.mxu0 %v2468_v59  ;;  %v2399_v59 = vld [vmem:[%s4181_s5 + $0x80] ss:$16 sps:$4 sm:$0xff]  }
  0xe2   :  { %v190_v60 = vpop.f32.mrf.mxu0 }
  0xe3   :  { %v191_v45 = vadd.f32 %v190_v60, %v69_v15  ;;  %v2407_v60 = vld [vmem:[%s4181_s5 + $0x64] ss:$16 sps:$4 sm:$0xff]  }
  0xe4   :  { %v192_v61 = vpop.f32.mrf.mxu0 }
  0xe5   :  { %v193_v43 = vadd.f32 %v192_v61, %v73_v17  ;;  %v229_v51 = vmax.f32 %v191_v45, 0.0  ;;  %v2405_v61 = vld [vmem:[%s4181_s5 + $0x60] ss:$16 sps:$4 sm:$0xff]   ;;  %v3120_v45 = vld [vmem:[%s4184_s6 + $0x8c] ss:$16 sps:$4 sm:$0xff]  }
  0xe6   :  { %v194_v62 = vpop.f32.mrf.mxu0 }
  0xe7   :  { %v195_v41 = vadd.f32 %v194_v62, %v69_v15  ;;  %v230_v49 = vmax.f32 %v193_v43, 0.0  ;;  %v2413_v62 = vld [vmem:[%s4181_s5 + $0x44] ss:$16 sps:$4 sm:$0xff]   ;;  %v3108_v43 = vld [vmem:[%s4184_s6 + $0xa8] ss:$16 sps:$4 sm:$0xff]  }
  0xe8   :  { %v196_v63 = vpop.f32.mrf.mxu0 }
  0xe9   :  { %v197_v39 = vadd.f32 %v196_v63, %v73_v17  ;;  %v231_v48 = vmax.f32 %v195_v41, 0.0  ;;  %v2411_v63 = vld [vmem:[%s4181_s5 + $0x40] ss:$16 sps:$4 sm:$0xff]   ;;  %v3096_v41 = vld [vmem:[%s4184_s6 + $0xac] ss:$16 sps:$4 sm:$0xff]  }
  0xea   :  { %v200_v0 = vpop.f32.mrf.mxu0 }
  0xeb   :  { %v201_v37 = vadd.f32 %v200_v0, %v69_v15  ;;  %v232_v47 = vmax.f32 %v197_v39, 0.0  ;;  %v2419_v0 = vld [vmem:[%s4181_s5 + $0x24] ss:$16 sps:$4 sm:$0xff]   ;;  %v3084_v39 = vld [vmem:[%s4184_s6 + $0xc8] ss:$16 sps:$4 sm:$0xff]  }
  0xec   :  { %v202_v1 = vpop.f32.mrf.mxu0 }
  0xed   :  { %v203_v35 = vadd.f32 %v202_v1, %v73_v17  ;;  %v233_v46 = vmax.f32 %v201_v37, 0.0  ;;  %v2417_v1 = vld [vmem:[%s4181_s5 + $0x20] ss:$16 sps:$4 sm:$0xff]  }
  0xee   :  { %v204_v2 = vpop.f32.mrf.mxu0 }
  0xef   :  { %v205_v33 = vadd.f32 %v204_v2, %v69_v15  ;;  %v234_v44 = vmax.f32 %v203_v35, 0.0  ;;  %v2425_v2 = vld [vmem:[%s4181_s5 + $0x4] ss:$16 sps:$4 sm:$0xff]  }
  0xf0   :  { %v206_v3 = vpop.f32.mrf.mxu0  ;;  %v3067_v35 = vld [vmem:[%s4184_s6 + $0xc4] ss:$16 sps:$4 sm:$0xff]  }
  0xf1   :  { %v207_v31 = vadd.f32 %v206_v3, %v73_v17  ;;  %v235_v42 = vmax.f32 %v205_v33, 0.0  ;;  %v2423_v3 = vld [vmem:[%s4181_s5] ss:$16 sps:$4 sm:$0xff]   ;;  %v3062_v33 = vld [vmem:[%s4184_s6 + $0xe8] ss:$16 sps:$4 sm:$0xff]  }
  0xf2   :  { %v210_v5 = vpop.f32.mrf.mxu0 }
  0xf3   :  { %v211_v29 = vadd.f32 %v210_v5, %v69_v15  ;;  %v236_v40 = vmax.f32 %v207_v31, 0.0  ;;  %v2429_v5 = vld [vmem:[%s4181_s5 + $0x1e0] ss:$16 sps:$4 sm:$0xff]  }
  0xf4   :  { %v212_v6 = vpop.f32.mrf.mxu0 }
  0xf5   :  { %v213_v27 = vadd.f32 %v212_v6, %v73_v17  ;;  %v237_v38 = vmax.f32 %v211_v29, 0.0  ;;  %v2437_v6 = vld [vmem:[%s4181_s5 + $0x1c4] ss:$16 sps:$4 sm:$0xff]  }
  0xf6   :  { %v214_v8 = vpop.f32.mrf.mxu0 }
  0xf7   :  { %v215_v25 = vadd.f32 %v214_v8, %v69_v15  ;;  %v238_v36 = vmax.f32 %v213_v27, 0.0  ;;  %v2435_v8 = vld [vmem:[%s4181_s5 + $0x1c0] ss:$16 sps:$4 sm:$0xff]  }
  0xf8   :  { %v216_v9 = vpop.f32.mrf.mxu0  ;;  %v3050_v27 = vld [vmem:[%s4185_s4] sm:$0xff] }
  0xf9   :  { %v217_v23 = vadd.f32 %v216_v9, %v73_v17  ;;  %v239_v34 = vmax.f32 %v215_v25, 0.0  ;;  %v2443_v9 = vld [vmem:[%s4181_s5 + $0x1a4] ss:$16 sps:$4 sm:$0xff]   ;;  %4363 = vst [vmem:[#allocation4_spill] sm:$0xff] %v3050_v27  ;;  %v942_v29 = vcombine.high %v3050_v27, %v3050_v27 }
  0xfa   :  { %v220_v11 = vpop.f32.mrf.mxu0  ;;  %v3038_v25 = vld [vmem:[%s4184_s6 + $0xe4] ss:$16 sps:$4 sm:$0xff]  }
  0xfb   :  { %v221_v22 = vadd.f32 %v220_v11, %v69_v15  ;;  %v240_v32 = vmax.f32 %v217_v23, 0.0  ;;  %v2441_v11 = vld [vmem:[%s4181_s5 + $0x1a0] ss:$16 sps:$4 sm:$0xff]   ;;  %v945_v37 = vpack.c.bf16 %v942_v29, %v942_v29  ;;  %v3372_v29 = vld [vmem:[%s4184_s6 + $0x148] ss:$16 sps:$4 sm:$0xff]  }
  0xfc   :  { %v222_v14 = vpop.f32.mrf.mxu0  ;;  %v2471_v23 = vld [vmem:[%s4181_s5 + $0x100] ss:$16 sps:$4 sm:$0xff]   ;;  %4375 = vst [vmem:[#allocation16_spill] sm:$0xff] %v3372_v29 }
  0xfd   :  { %v223_v20 = vadd.f32 %v222_v14, %v73_v17  ;;  %v241_v30 = vmax.f32 %v221_v22, 0.0  ;;  %v2447_v14 = vld [vmem:[%s4181_s5 + $0x180] ss:$16 sps:$4 sm:$0xff]   ;;  %v2476_v22 = vld [vmem:[%s4181_s5 + $0x10c] ss:$16 sps:$4 sm:$0xff]  }
  0xfe   :  { %v224_v16 = vpop.f32.mrf.mxu0  ;;  %930 = vmatprep.subr.bf16.mxu0 %v2476_v22  ;;  %v3348_v22 = vld [vmem:[%s4184_s6 + $0x168] ss:$16 sps:$4 sm:$0xff]  }
  0xff   :  { %v225_v18 = vadd.f32 %v224_v16, %v69_v15  ;;  %v242_v28 = vmax.f32 %v223_v20, 0.0  ;;  %v2455_v15 = vld [vmem:[%s4181_s5 + $0x164] ss:$16 sps:$4 sm:$0xff]   ;;  %v2453_v16 = vld [vmem:[%s4181_s5 + $0x160] ss:$16 sps:$4 sm:$0xff]   ;;  %4371 = vst [vmem:[#allocation12_spill] sm:$0xff] %v3348_v22 }
 0x100   :  { %v226_v19 = vpop.f32.mrf.mxu0  ;;  %v2465_v20 = vld [vmem:[%s4181_s5 + $0x120] ss:$16 sps:$4 sm:$0xff]  }
 0x101   :  { %v227_v21 = vadd.f32 %v226_v19, %v73_v17  ;;  %v243_v26 = vmax.f32 %v225_v18, 0.0  ;;  %v2461_v17 = vld [vmem:[%s4181_s5 + $0x144] ss:$16 sps:$4 sm:$0xff]   ;;  %v2459_v18 = vld [vmem:[%s4181_s5 + $0x140] ss:$16 sps:$4 sm:$0xff]  }
 0x102   :  { %v2467_v19 = vld [vmem:[%s4181_s5 + $0x124] ss:$16 sps:$4 sm:$0xff]  }
 0x103   :  { %v244_v24 = vmax.f32 %v227_v21, 0.0  ;;  %v2473_v21 = vld [vmem:[%s4181_s5 + $0x104] ss:$16 sps:$4 sm:$0xff]  }
 0x105   :  { %266 = vmatprep.subr.mxu1 %v244_v24  ;;  %v2474_v24 = vld [vmem:[%s4181_s5 + $0x108] ss:$16 sps:$4 sm:$0xff]  }
 0x106   :  { %267 = vmatpush1.msra.mxu1 %v243_v26  ;;  %931 = vmatpush2.bf16.msra.mxu0 %v2474_v24  ;;  %v3044_v26 = vld [vmem:[%s4184_s6 + $0xec] ss:$16 sps:$4 sm:$0xff]  }
 0x107   :  { %268 = vmatprep.subr.mxu1 %v242_v28  ;;  %1307 = vmatprep.subr.bf16.mxu0 %v3044_v26  ;;  %v3360_v24 = vld [vmem:[%s4184_s6 + $0x14c] ss:$16 sps:$4 sm:$0xff]  }
 0x108   :  { %269 = vmatpush1.msra.mxu1 %v241_v30  ;;  %4373 = vst [vmem:[#allocation14_spill] sm:$0xff] %v3360_v24 }
 0x109   :  { %270 = vmatprep.subr.mxu1 %v240_v32  ;;  %v3057_v32 = vld [vmem:[%s4184_s6 + $0xe0] ss:$16 sps:$4 sm:$0xff]  }
 0x10a   :  { %271 = vmatpush1.msra.mxu1 %v239_v34 }
 0x10b   :  { %272 = vmatprep.subr.mxu1 %v238_v36  ;;  %v3072_v36 = vld [vmem:[%s4184_s6 + $0xcc] ss:$16 sps:$4 sm:$0xff]  }
 0x10c   :  { %273 = vmatpush1.msra.mxu1 %v237_v38  ;;  %v3079_v38 = vld [vmem:[%s4184_s6 + $0xc0] ss:$16 sps:$4 sm:$0xff]  }
 0x10d   :  { %274 = vmatprep.subr.mxu1 %v236_v40  ;;  %v3091_v40 = vld [vmem:[%s4184_s6 + $0xa4] ss:$16 sps:$4 sm:$0xff]  }
 0x10e   :  { %275 = vmatpush1.msra.mxu1 %v235_v42  ;;  %v3103_v42 = vld [vmem:[%s4184_s6 + $0xa0] ss:$16 sps:$4 sm:$0xff]  }
 0x10f   :  { %276 = vmatprep.subr.mxu1 %v234_v44  ;;  %v3115_v44 = vld [vmem:[%s4184_s6 + $0x84] ss:$16 sps:$4 sm:$0xff]  }
 0x110   :  { %277 = vmatpush1.msra.mxu1 %v233_v46  ;;  %v3127_v46 = vld [vmem:[%s4184_s6 + $0x80] ss:$16 sps:$4 sm:$0xff]  }
 0x111   :  { %278 = vmatprep.subr.mxu1 %v232_v47  ;;  %v3132_v47 = vld [vmem:[%s4184_s6 + $0x88] ss:$16 sps:$4 sm:$0xff]  }
 0x112   :  { %279 = vmatpush1.msra.mxu1 %v231_v48  ;;  %v3139_v48 = vld [vmem:[%s4184_s6 + $0x64] ss:$16 sps:$4 sm:$0xff]  }
 0x113   :  { %280 = vmatprep.subr.mxu1 %v230_v49  ;;  %v3144_v49 = vld [vmem:[%s4184_s6 + $0x6c] ss:$16 sps:$4 sm:$0xff]  }
 0x114   :  { %281 = vmatpush1.msra.mxu1 %v229_v51  ;;  %v3156_v51 = vld [vmem:[%s4184_s6 + $0x68] ss:$16 sps:$4 sm:$0xff]  }
 0x115   :  { %2162 = vmatmul.mubr.msk.f32.vlgmr.msra.gmra.mxu1 %vm246_vm0, %v245_v52  ;;  %859 = vmatprep.subr.bf16.mxu1 %v2383_v50  ;;  %v3151_v50 = vld [vmem:[%s4184_s6 + $0x60] ss:$16 sps:$4 sm:$0xff]   ;;  %v3163_v52 = vld [vmem:[%s4184_s6 + $0x44] ss:$16 sps:$4 sm:$0xff]  }
 0x116   :  { %860 = vmatpush1.bf16.msra.mxu1 %v2381_v53  ;;  %v3168_v53 = vld [vmem:[%s4184_s6 + $0x4c] ss:$16 sps:$4 sm:$0xff]  }
 0x117   :  { %861 = vmatprep.subr.bf16.mxu1 %v2389_v54  ;;  %v3175_v54 = vld [vmem:[%s4184_s6 + $0x40] ss:$16 sps:$4 sm:$0xff]  }
 0x11a   :  { %862 = vmatpush1.bf16.msra.mxu1 %v2387_v55  ;;  %v3180_v55 = vld [vmem:[%s4184_s6 + $0x48] ss:$16 sps:$4 sm:$0xff]  }
 0x11b   :  { %863 = vmatprep.subr.bf16.mxu1 %v2395_v56  ;;  %v3187_v56 = vld [vmem:[%s4184_s6 + $0x24] ss:$16 sps:$4 sm:$0xff]  }
 0x11e   :  { %864 = vmatpush1.bf16.msra.mxu1 %v2393_v57  ;;  %v3192_v57 = vld [vmem:[%s4184_s6 + $0x2c] ss:$16 sps:$4 sm:$0xff]  }
 0x11f   :  { %865 = vmatprep.subr.bf16.mxu1 %v2401_v58  ;;  %v3199_v58 = vld [vmem:[%s4184_s6 + $0x20] ss:$16 sps:$4 sm:$0xff]  }
 0x122   :  { %866 = vmatpush1.bf16.msra.mxu1 %v2399_v59  ;;  %v3204_v59 = vld [vmem:[%s4184_s6 + $0x28] ss:$16 sps:$4 sm:$0xff]  }
 0x123   :  { %867 = vmatprep.subr.bf16.mxu1 %v2407_v60  ;;  %v3211_v60 = vld [vmem:[%s4184_s6 + $0x4] ss:$16 sps:$4 sm:$0xff]  }
 0x126   :  { %868 = vmatpush1.bf16.msra.mxu1 %v2405_v61  ;;  %v3216_v61 = vld [vmem:[%s4184_s6 + $0xc] ss:$16 sps:$4 sm:$0xff]  }
 0x127   :  { %869 = vmatprep.subr.bf16.mxu1 %v2413_v62  ;;  %v3223_v62 = vld [vmem:[%s4184_s6] ss:$16 sps:$4 sm:$0xff]  }
 0x12a   :  { %870 = vmatpush1.bf16.msra.mxu1 %v2411_v63  ;;  %v3228_v63 = vld [vmem:[%s4184_s6 + $0x8] ss:$16 sps:$4 sm:$0xff]  }
 0x12b   :  { %871 = vmatprep.subr.bf16.mxu1 %v2419_v0  ;;  %v3235_v0 = vld [vmem:[%s4184_s6 + $0x1e4] ss:$16 sps:$4 sm:$0xff]  }
 0x12e   :  { %872 = vmatpush1.bf16.msra.mxu1 %v2417_v1  ;;  %v3240_v1 = vld [vmem:[%s4184_s6 + $0x1ec] ss:$16 sps:$4 sm:$0xff]  }
 0x12f   :  { %873 = vmatprep.subr.bf16.mxu1 %v2425_v2  ;;  %v3247_v2 = vld [vmem:[%s4184_s6 + $0x1e0] ss:$16 sps:$4 sm:$0xff]  }
 0x132   :  { %874 = vmatpush1.bf16.msra.mxu1 %v2423_v3  ;;  %v3252_v3 = vld [vmem:[%s4184_s6 + $0x1e8] ss:$16 sps:$4 sm:$0xff]  }
 0x133   :  { %875 = vmatprep.subr.bf16.mxu1 %v2431_v4  ;;  %v3259_v4 = vld [vmem:[%s4184_s6 + $0x1c4] ss:$16 sps:$4 sm:$0xff]  }
 0x136   :  { %876 = vmatpush2.bf16.msra.mxu1 %v2429_v5  ;;  %v3264_v5 = vld [vmem:[%s4184_s6 + $0x1cc] ss:$16 sps:$4 sm:$0xff]  }
 0x137   :  { %877 = vmatprep.subr.bf16.mxu1 %v2437_v6  ;;  %v3271_v6 = vld [vmem:[%s4184_s6 + $0x1c0] ss:$16 sps:$4 sm:$0xff]  }
 0x13a   :  { %878 = vmatpush2.bf16.msra.mxu1 %v2435_v8  ;;  %v3276_v8 = vld [vmem:[%s4184_s6 + $0x1c8] ss:$16 sps:$4 sm:$0xff]  }
 0x13b   :  { %879 = vmatprep.subr.bf16.mxu1 %v2443_v9  ;;  %v3283_v9 = vld [vmem:[%s4184_s6 + $0x1a4] ss:$16 sps:$4 sm:$0xff]  }
 0x13e   :  { %880 = vmatpush2.bf16.msra.mxu1 %v2441_v11  ;;  %v3288_v11 = vld [vmem:[%s4184_s6 + $0x1ac] ss:$16 sps:$4 sm:$0xff]  }
 0x13f   :  { %881 = vmatprep.subr.bf16.mxu1 %v2449_v12  ;;  %v3295_v12 = vld [vmem:[%s4184_s6 + $0x1a0] ss:$16 sps:$4 sm:$0xff]  }
 0x142   :  { %882 = vmatpush2.bf16.msra.mxu1 %v2447_v14  ;;  %v3300_v14 = vld [vmem:[%s4184_s6 + $0x1a8] ss:$16 sps:$4 sm:$0xff]  }
 0x143   :  { %883 = vmatprep.subr.bf16.mxu1 %v2455_v15  ;;  %v3307_v15 = vld [vmem:[%s4184_s6 + $0x184] ss:$16 sps:$4 sm:$0xff]  }
 0x144   :  { %4364 = vst [vmem:[#allocation5_spill] sm:$0xff] %v3307_v15 }
 0x146   :  { %884 = vmatpush2.bf16.msra.mxu1 %v2453_v16  ;;  %v3312_v16 = vld [vmem:[%s4184_s6 + $0x18c] ss:$16 sps:$4 sm:$0xff]  }
 0x147   :  { %885 = vmatprep.subr.bf16.mxu1 %v2461_v17  ;;  %4365 = vst [vmem:[#allocation6_spill] sm:$0xff] %v3312_v16  ;;  %v3319_v17 = vld [vmem:[%s4184_s6 + $0x180] ss:$16 sps:$4 sm:$0xff]  }
 0x148   :  { %4366 = vst [vmem:[#allocation7_spill] sm:$0xff] %v3319_v17 }
 0x14a   :  { %886 = vmatpush2.bf16.msra.mxu1 %v2459_v18  ;;  %v3324_v18 = vld [vmem:[%s4184_s6 + $0x188] ss:$16 sps:$4 sm:$0xff]  }
 0x14b   :  { %887 = vmatprep.subr.bf16.mxu1 %v2467_v19  ;;  %4367 = vst [vmem:[#allocation8_spill] sm:$0xff] %v3324_v18  ;;  %v3331_v19 = vld [vmem:[%s4184_s6 + $0x164] ss:$16 sps:$4 sm:$0xff]  }
 0x14c   :  { %4368 = vst [vmem:[#allocation9_spill] sm:$0xff] %v3331_v19 }
 0x14e   :  { %888 = vmatpush2.bf16.msra.mxu1 %v2465_v20  ;;  %v3336_v20 = vld [vmem:[%s4184_s6 + $0x16c] ss:$16 sps:$4 sm:$0xff]  }
 0x14f   :  { %889 = vmatprep.subr.bf16.mxu1 %v2473_v21  ;;  %4369 = vst [vmem:[#allocation10_spill] sm:$0xff] %v3336_v20  ;;  %v3343_v21 = vld [vmem:[%s4184_s6 + $0x160] ss:$16 sps:$4 sm:$0xff]  }
 0x150   :  { %4370 = vst [vmem:[#allocation11_spill] sm:$0xff] %v3343_v21 }
 0x152   :  { %890 = vmatpush2.bf16.msra.mxu1 %v2471_v23  ;;  %v3355_v23 = vld [vmem:[%s4184_s6 + $0x144] ss:$16 sps:$4 sm:$0xff]  }
 0x153   :  { %1266 = vmatprep.subr.bf16.mxu1 %v3038_v25  ;;  %4372 = vst [vmem:[#allocation13_spill] sm:$0xff] %v3355_v23 }
 0x1d5   :  { %v316_v28 = vpop.f32.mrf.mxu1 }
 0x1d6   :  { %v451_v34 = vpack.c.bf16 %v316_v28, %v316_v28  ;;  %v3367_v28 = vld [vmem:[%s4184_s6 + $0x140] ss:$16 sps:$4 sm:$0xff]  }
 0x1d7   :  { %v318_v30 = vpop.f32.mrf.mxu1  ;;  %4374 = vst [vmem:[#allocation15_spill] sm:$0xff] %v3367_v28 }
 0x1d8   :  { %v452_v31 = vpack.c.bf16 %v318_v30, %v318_v30  ;;  %v3379_v30 = vld [vmem:[%s4184_s6 + $0x124] ss:$16 sps:$4 sm:$0xff]  }
 0x1d9   :  { %4376 = vst [vmem:[#allocation17_spill] sm:$0xff] %v3379_v30 }
 0x1da   :  { %891 = vmatprep.mubr.bf16.mxu1 %v452_v31  ;;  %932 = vmatprep.mubr.bf16.mxu0 %v452_v31  ;;  %v3384_v31 = vld [vmem:[%s4184_s6 + $0x12c] ss:$16 sps:$4 sm:$0xff]  }
 0x1db   :  { %892 = vmatmul.mubr.bf16.vlgmr.msra.gmra.mxu1 %v451_v34  ;;  %933 = vmatmul.mubr.bf16.vlgmr.msra.gmra.mxu0 %v451_v34  ;;  %4377 = vst [vmem:[#allocation18_spill] sm:$0xff] %v3384_v31  ;;  %v3391_v34 = vld [vmem:[%s4184_s6 + $0x120] ss:$16 sps:$4 sm:$0xff]  }
 0x1dc   :  { %1267 = vmatpush1.bf16.msra.mxu1 %v3057_v32  ;;  %1308 = vmatpush1.bf16.msra.mxu0 %v3062_v33  ;;  %4378 = vst [vmem:[#allocation19_spill] sm:$0xff] %v3391_v34 }
 0x1dd   :  { %1268 = vmatprep.subr.bf16.mxu1 %v3067_v35  ;;  %1309 = vmatprep.subr.bf16.mxu0 %v3072_v36 }
 0x1de   :  { %1298 = vmatprep.mubr.bf16.mxu1 %v945_v37  ;;  %1339 = vmatprep.mubr.bf16.mxu0 %v945_v37  ;;  %v3396_v37 = vld [vmem:[%s4184_s6 + $0x128] ss:$16 sps:$4 sm:$0xff]  }
 0x1df   :  { %4379 = vst [vmem:[#allocation20_spill] sm:$0xff] %v3396_v37 }
 0x1e0   :  { %1269 = vmatpush1.bf16.msra.mxu1 %v3079_v38  ;;  %1310 = vmatpush1.bf16.msra.mxu0 %v3084_v39 }
 0x1e1   :  { %1270 = vmatprep.subr.bf16.mxu1 %v3091_v40  ;;  %1311 = vmatprep.subr.bf16.mxu0 %v3096_v41 }
 0x1e4   :  { %1271 = vmatpush1.bf16.msra.mxu1 %v3103_v42  ;;  %1312 = vmatpush1.bf16.msra.mxu0 %v3108_v43 }
 0x1e5   :  { %1272 = vmatprep.subr.bf16.mxu1 %v3115_v44  ;;  %1313 = vmatprep.subr.bf16.mxu0 %v3120_v45 }
 0x1e8   :  { %1273 = vmatpush1.bf16.msra.mxu1 %v3127_v46  ;;  %1314 = vmatpush1.bf16.msra.mxu0 %v3132_v47 }
 0x1e9   :  { %1274 = vmatprep.subr.bf16.mxu1 %v3139_v48  ;;  %1315 = vmatprep.subr.bf16.mxu0 %v3144_v49 }
 0x1ec   :  { %1275 = vmatpush1.bf16.msra.mxu1 %v3151_v50  ;;  %1316 = vmatpush1.bf16.msra.mxu0 %v3156_v51 }
 0x1ed   :  { %1276 = vmatprep.subr.bf16.mxu1 %v3163_v52  ;;  %1317 = vmatprep.subr.bf16.mxu0 %v3168_v53 }
 0x1f0   :  { %1277 = vmatpush1.bf16.msra.mxu1 %v3175_v54  ;;  %1318 = vmatpush1.bf16.msra.mxu0 %v3180_v55 }
 0x1f1   :  { %1278 = vmatprep.subr.bf16.mxu1 %v3187_v56  ;;  %1319 = vmatprep.subr.bf16.mxu0 %v3192_v57 }
 0x1f4   :  { %1279 = vmatpush1.bf16.msra.mxu1 %v3199_v58  ;;  %1320 = vmatpush1.bf16.msra.mxu0 %v3204_v59 }
 0x1f5   :  { %1280 = vmatprep.subr.bf16.mxu1 %v3211_v60  ;;  %1321 = vmatprep.subr.bf16.mxu0 %v3216_v61 }
 0x1f8   :  { %1281 = vmatpush1.bf16.msra.mxu1 %v3223_v62  ;;  %1322 = vmatpush1.bf16.msra.mxu0 %v3228_v63 }
 0x1f9   :  { %1282 = vmatprep.subr.bf16.mxu1 %v3235_v0  ;;  %1323 = vmatprep.subr.bf16.mxu0 %v3240_v1 }
 0x1fc   :  { %1283 = vmatpush2.bf16.msra.mxu1 %v3247_v2  ;;  %1324 = vmatpush2.bf16.msra.mxu0 %v3252_v3 }
 0x1fd   :  { %1284 = vmatprep.subr.bf16.mxu1 %v3259_v4  ;;  %1325 = vmatprep.subr.bf16.mxu0 %v3264_v5 }
 0x200   :  { %1285 = vmatpush2.bf16.msra.mxu1 %v3271_v6  ;;  %1326 = vmatpush2.bf16.msra.mxu0 %v3276_v8 }
 0x201   :  { %1286 = vmatprep.subr.bf16.mxu1 %v3283_v9  ;;  %1327 = vmatprep.subr.bf16.mxu0 %v3288_v11 }
 0x204   :  { %1287 = vmatpush2.bf16.msra.mxu1 %v3295_v12  ;;  %1328 = vmatpush2.bf16.msra.mxu0 %v3300_v14 }
 0x205   :  { %1288 = vmatprep.subr.bf16.mxu1 %v3307_v15  ;;  %1329 = vmatprep.subr.bf16.mxu0 %v3312_v16 }
 0x208   :  { %1289 = vmatpush2.bf16.msra.mxu1 %v3319_v17  ;;  %1330 = vmatpush2.bf16.msra.mxu0 %v3324_v18 }
 0x209   :  { %1290 = vmatprep.subr.bf16.mxu1 %v3331_v19  ;;  %1331 = vmatprep.subr.bf16.mxu0 %v3336_v20 }
 0x20c   :  { %1291 = vmatpush2.bf16.msra.mxu1 %v3343_v21  ;;  %1332 = vmatpush2.bf16.msra.mxu0 %v3348_v22 }
 0x20d   :  { %1292 = vmatprep.subr.bf16.mxu1 %v3355_v23  ;;  %1333 = vmatprep.subr.bf16.mxu0 %v3360_v24  ;;  %v944_v24 = vpack.c.bf16 %v3050_v27, %v3050_v27  ;;  %v3441_v27 = vld [vmem:[%s4186_s8 + $0x170] ss:$8 sps:$4 sm:$0xff]  }
 0x20e   :  { %4386 = vst [vmem:[#allocation27_spill] sm:$0xff] %v3441_v27 }
 0x210   :  { %1293 = vmatpush2.bf16.msra.mxu1 %v3367_v28  ;;  %1334 = vmatpush2.bf16.msra.mxu0 %v3372_v29  ;;  %v3403_v28 = vld [vmem:[%s4184_s6 + $0x104] ss:$16 sps:$4 sm:$0xff]   ;;  %v3408_v29 = vld [vmem:[%s4184_s6 + $0x10c] ss:$16 sps:$4 sm:$0xff]  }
 0x211   :  { %1294 = vmatprep.subr.bf16.mxu1 %v3379_v30  ;;  %1335 = vmatprep.subr.bf16.mxu0 %v3384_v31  ;;  %4380 = vst [vmem:[#allocation21_spill] sm:$0xff] %v3403_v28  ;;  %4381 = vst [vmem:[#allocation22_spill] sm:$0xff] %v3408_v29  ;;  %v3415_v30 = vld [vmem:[%s4184_s6 + $0x100] ss:$16 sps:$4 sm:$0xff]   ;;  %v3420_v31 = vld [vmem:[%s4184_s6 + $0x108] ss:$16 sps:$4 sm:$0xff]  }
 0x212   :  { %4382 = vst [vmem:[#allocation23_spill] sm:$0xff] %v3415_v30  ;;  %4383 = vst [vmem:[#allocation24_spill] sm:$0xff] %v3420_v31 }
 0x214   :  { %1295 = vmatpush2.bf16.msra.mxu1 %v3391_v34  ;;  %1336 = vmatpush2.bf16.msra.mxu0 %v3396_v37  ;;  %v3431_v37 = vld [vmem:[%s4186_s8 + $0x70] ss:$8 sps:$4 sm:$0xff]   ;;  %v3511_v34 = vld [vmem:[%s4186_s8 + $0x40] ss:$8 sps:$4 sm:$0xff]  }
 0x215   :  { %1296 = vmatprep.subr.bf16.mxu1 %v3403_v28  ;;  %1337 = vmatprep.subr.bf16.mxu0 %v3408_v29  ;;  %4384 = vst [vmem:[#allocation25_spill] sm:$0xff] %v3431_v37  ;;  %v3436_v28 = vld [vmem:[%s4186_s8 + $0x74] ss:$8 sps:$4 sm:$0xff]   ;;  %v3464_v29 = vld [vmem:[%s4186_s8 + $0x160] ss:$8 sps:$4 sm:$0xff]   ;;  %4398 = vst [vmem:[#allocation39_spill] sm:$0xff] %v3511_v34 }
 0x216   :  { %4385 = vst [vmem:[#allocation26_spill] sm:$0xff] %v3436_v28  ;;  %4390 = vst [vmem:[#allocation31_spill] sm:$0xff] %v3464_v29 }
 0x218   :  { %1297 = vmatpush2.bf16.msra.mxu1 %v3415_v30  ;;  %1338 = vmatpush2.bf16.msra.mxu0 %v3420_v31  ;;  %v3446_v31 = vld [vmem:[%s4186_s8 + $0x174] ss:$8 sps:$4 sm:$0xff]   ;;  %v3457_v30 = vld [vmem:[%s4186_s8 + $0x64] ss:$8 sps:$4 sm:$0xff]  }
 0x219   :  { %4387 = vst [vmem:[#allocation28_spill] sm:$0xff] %v3446_v31  ;;  %1676 = vmatprep.subr.bf16.mxu1 %v3436_v28  ;;  %4389 = vst [vmem:[#allocation30_spill] sm:$0xff] %v3457_v30  ;;  %1717 = vmatprep.subr.bf16.mxu0 %v3446_v31  ;;  %v3471_v28 = vld [vmem:[%s4186_s8 + $0x164] ss:$8 sps:$4 sm:$0xff]   ;;  %v3476_v31 = vld [vmem:[%s4186_s8 + $0x54] ss:$8 sps:$4 sm:$0xff]  }
 0x21a   :  { %4391 = vst [vmem:[#allocation32_spill] sm:$0xff] %v3471_v28  ;;  %4392 = vst [vmem:[#allocation33_spill] sm:$0xff] %v3476_v31 }
 0x21b   :  { %1299 = vmatmul.mubr.bf16.vlgmr.msra.gmra.mxu1 %v944_v24  ;;  %1340 = vmatmul.mubr.bf16.vlgmr.msra.gmra.mxu0 %v944_v24  ;;  %v3452_v24 = vld [vmem:[%s4186_s8 + $0x60] ss:$8 sps:$4 sm:$0xff]  }
 0x21c   :  { %4388 = vst [vmem:[#allocation29_spill] sm:$0xff] %v3452_v24  ;;  %1677 = vmatpush1.bf16.msra.mxu1 %v3431_v37  ;;  %1718 = vmatpush1.bf16.msra.mxu0 %v3441_v27  ;;  %v3482_v37 = vld [vmem:[%s4186_s8 + $0x50] ss:$8 sps:$4 sm:$0xff]  }
 0x21d   :  { %1678 = vmatprep.subr.bf16.mxu1 %v3457_v30  ;;  %1719 = vmatprep.subr.bf16.mxu0 %v3471_v28  ;;  %4393 = vst [vmem:[#allocation34_spill] sm:$0xff] %v3482_v37  ;;  %v3487_v30 = vld [vmem:[%s4186_s8 + $0x154] ss:$8 sps:$4 sm:$0xff]   ;;  %v3493_v27 = vld [vmem:[%s4186_s8 + $0x150] ss:$8 sps:$4 sm:$0xff]  }
 0x21e   :  { %4394 = vst [vmem:[#allocation35_spill] sm:$0xff] %v3487_v30  ;;  %4395 = vst [vmem:[#allocation36_spill] sm:$0xff] %v3493_v27  ;;  %v3500_v28 = vld [vmem:[%s4186_s8 + $0x44] ss:$8 sps:$4 sm:$0xff]  }
 0x21f   :  { %4396 = vst [vmem:[#allocation37_spill] sm:$0xff] %v3500_v28 }
 0x220   :  { %1679 = vmatpush1.bf16.msra.mxu1 %v3452_v24  ;;  %1720 = vmatpush1.bf16.msra.mxu0 %v3464_v29  ;;  %v3506_v24 = vld [vmem:[%s4186_s8 + $0x144] ss:$8 sps:$4 sm:$0xff]   ;;  %v3535_v29 = vld [vmem:[%s4186_s8 + $0x30] ss:$8 sps:$4 sm:$0xff]  }
 0x221   :  { %1680 = vmatprep.subr.bf16.mxu1 %v3476_v31  ;;  %1721 = vmatprep.subr.bf16.mxu0 %v3487_v30  ;;  %4397 = vst [vmem:[#allocation38_spill] sm:$0xff] %v3506_v24  ;;  %v3517_v31 = vld [vmem:[%s4186_s8 + $0x140] ss:$8 sps:$4 sm:$0xff]   ;;  %v3524_v30 = vld [vmem:[%s4186_s8 + $0x34] ss:$8 sps:$4 sm:$0xff]   ;;  %4402 = vst [vmem:[#allocation43_spill] sm:$0xff] %v3535_v29 }
 0x222   :  { %4399 = vst [vmem:[#allocation40_spill] sm:$0xff] %v3517_v31  ;;  %4400 = vst [vmem:[#allocation41_spill] sm:$0xff] %v3524_v30 }
 0x224   :  { %1681 = vmatpush1.bf16.msra.mxu1 %v3482_v37  ;;  %1722 = vmatpush1.bf16.msra.mxu0 %v3493_v27  ;;  %v3530_v37 = vld [vmem:[%s4186_s8 + $0x134] ss:$8 sps:$4 sm:$0xff]   ;;  %v3559_v27 = vld [vmem:[%s4186_s8 + $0x20] ss:$8 sps:$4 sm:$0xff]  }
 0x225   :  { %1682 = vmatprep.subr.bf16.mxu1 %v3500_v28  ;;  %1723 = vmatprep.subr.bf16.mxu0 %v3506_v24  ;;  %4401 = vst [vmem:[#allocation42_spill] sm:$0xff] %v3530_v37  ;;  %v3541_v28 = vld [vmem:[%s4186_s8 + $0x130] ss:$8 sps:$4 sm:$0xff]   ;;  %v3548_v24 = vld [vmem:[%s4186_s8 + $0x24] ss:$8 sps:$4 sm:$0xff]   ;;  %4406 = vst [vmem:[#allocation47_spill] sm:$0xff] %v3559_v27 }
 0x226   :  { %4403 = vst [vmem:[#allocation44_spill] sm:$0xff] %v3541_v28  ;;  %4404 = vst [vmem:[#allocation45_spill] sm:$0xff] %v3548_v24 }
 0x228   :  { %1683 = vmatpush1.bf16.msra.mxu1 %v3511_v34  ;;  %1724 = vmatpush1.bf16.msra.mxu0 %v3517_v31  ;;  %v3554_v34 = vld [vmem:[%s4186_s8 + $0x124] ss:$8 sps:$4 sm:$0xff]   ;;  %v3583_v31 = vld [vmem:[%s4186_s8 + $0x10] ss:$8 sps:$4 sm:$0xff]  }
 0x229   :  { %1684 = vmatprep.subr.bf16.mxu1 %v3524_v30  ;;  %1725 = vmatprep.subr.bf16.mxu0 %v3530_v37  ;;  %4405 = vst [vmem:[#allocation46_spill] sm:$0xff] %v3554_v34  ;;  %v3565_v30 = vld [vmem:[%s4186_s8 + $0x120] ss:$8 sps:$4 sm:$0xff]   ;;  %v3572_v37 = vld [vmem:[%s4186_s8 + $0x14] ss:$8 sps:$4 sm:$0xff]   ;;  %4410 = vst [vmem:[#allocation51_spill] sm:$0xff] %v3583_v31 }
 0x22a   :  { %4407 = vst [vmem:[#allocation48_spill] sm:$0xff] %v3565_v30  ;;  %4408 = vst [vmem:[#allocation49_spill] sm:$0xff] %v3572_v37 }
 0x22c   :  { %1685 = vmatpush1.bf16.msra.mxu1 %v3535_v29  ;;  %1726 = vmatpush1.bf16.msra.mxu0 %v3541_v28  ;;  %v3578_v29 = vld [vmem:[%s4186_s8 + $0x114] ss:$8 sps:$4 sm:$0xff]   ;;  %v3607_v28 = vld [vmem:[%s4186_s8] ss:$8 sps:$4 sm:$0xff]  }
 0x22d   :  { %1686 = vmatprep.subr.bf16.mxu1 %v3548_v24  ;;  %1727 = vmatprep.subr.bf16.mxu0 %v3554_v34  ;;  %4409 = vst [vmem:[#allocation50_spill] sm:$0xff] %v3578_v29  ;;  %v3589_v24 = vld [vmem:[%s4186_s8 + $0x110] ss:$8 sps:$4 sm:$0xff]   ;;  %v3596_v34 = vld [vmem:[%s4186_s8 + $0x4] ss:$8 sps:$4 sm:$0xff]   ;;  %4414 = vst [vmem:[#allocation55_spill] sm:$0xff] %v3607_v28 }
 0x22e   :  { %4411 = vst [vmem:[#allocation52_spill] sm:$0xff] %v3589_v24  ;;  %4412 = vst [vmem:[#allocation53_spill] sm:$0xff] %v3596_v34 }
 0x230   :  { %1687 = vmatpush1.bf16.msra.mxu1 %v3559_v27  ;;  %1728 = vmatpush1.bf16.msra.mxu0 %v3565_v30  ;;  %v3602_v27 = vld [vmem:[%s4186_s8 + $0x104] ss:$8 sps:$4 sm:$0xff]   ;;  %v3631_v30 = vld [vmem:[%s4186_s8 + $0xf0] ss:$8 sps:$4 sm:$0xff]  }
 0x231   :  { %1688 = vmatprep.subr.bf16.mxu1 %v3572_v37  ;;  %1729 = vmatprep.subr.bf16.mxu0 %v3578_v29  ;;  %4413 = vst [vmem:[#allocation54_spill] sm:$0xff] %v3602_v27  ;;  %v3613_v37 = vld [vmem:[%s4186_s8 + $0x100] ss:$8 sps:$4 sm:$0xff]   ;;  %v3620_v29 = vld [vmem:[%s4186_s8 + $0xf4] ss:$8 sps:$4 sm:$0xff]   ;;  %4418 = vst [vmem:[#allocation59_spill] sm:$0xff] %v3631_v30 }
 0x232   :  { %4415 = vst [vmem:[#allocation56_spill] sm:$0xff] %v3613_v37  ;;  %4416 = vst [vmem:[#allocation57_spill] sm:$0xff] %v3620_v29 }
 0x234   :  { %1689 = vmatpush1.bf16.msra.mxu1 %v3583_v31  ;;  %1730 = vmatpush1.bf16.msra.mxu0 %v3589_v24  ;;  %v3626_v31 = vld [vmem:[%s4186_s8 + $0x1f4] ss:$8 sps:$4 sm:$0xff]   ;;  %v3655_v24 = vld [vmem:[%s4186_s8 + $0xe0] ss:$8 sps:$4 sm:$0xff]  }
 0x235   :  { %1690 = vmatprep.subr.bf16.mxu1 %v3596_v34  ;;  %1731 = vmatprep.subr.bf16.mxu0 %v3602_v27  ;;  %4417 = vst [vmem:[#allocation58_spill] sm:$0xff] %v3626_v31  ;;  %v3637_v34 = vld [vmem:[%s4186_s8 + $0x1f0] ss:$8 sps:$4 sm:$0xff]   ;;  %v3644_v27 = vld [vmem:[%s4186_s8 + $0xe4] ss:$8 sps:$4 sm:$0xff]   ;;  %4422 = vst [vmem:[#allocation63_spill] sm:$0xff] %v3655_v24 }
 0x236   :  { %4419 = vst [vmem:[#allocation60_spill] sm:$0xff] %v3637_v34  ;;  %4420 = vst [vmem:[#allocation61_spill] sm:$0xff] %v3644_v27 }
 0x238   :  { %1691 = vmatpush1.bf16.msra.mxu1 %v3607_v28  ;;  %1732 = vmatpush1.bf16.msra.mxu0 %v3613_v37  ;;  %v3650_v28 = vld [vmem:[%s4186_s8 + $0x1e4] ss:$8 sps:$4 sm:$0xff]   ;;  %v3673_v37 = vld [vmem:[%s4186_s8 + $0x1d4] ss:$8 sps:$4 sm:$0xff]  }
 0x239   :  { %1692 = vmatprep.subr.bf16.mxu1 %v3620_v29  ;;  %1733 = vmatprep.subr.bf16.mxu0 %v3626_v31  ;;  %4421 = vst [vmem:[#allocation62_spill] sm:$0xff] %v3650_v28  ;;  %v3660_v29 = vld [vmem:[%s4186_s8 + $0x1e0] ss:$8 sps:$4 sm:$0xff]   ;;  %v3666_v31 = vld [vmem:[%s4186_s8 + $0xd4] ss:$8 sps:$4 sm:$0xff]   ;;  %4425 = vst [vmem:[#allocation66_spill] sm:$0xff] %v3673_v37 }
 0x23a   :  { %4423 = vst [vmem:[#allocation64_spill] sm:$0xff] %v3660_v29  ;;  %4424 = vst [vmem:[#allocation65_spill] sm:$0xff] %v3666_v31 }
 0x23c   :  { %1693 = vmatpush2.bf16.msra.mxu1 %v3631_v30  ;;  %1734 = vmatpush2.bf16.msra.mxu0 %v3637_v34  ;;  %v3680_v30 = vld [vmem:[%s4186_s8 + $0xd0] ss:$8 sps:$4 sm:$0xff]  }
 0x23d   :  { %1694 = vmatprep.subr.bf16.mxu1 %v3644_v27  ;;  %1735 = vmatprep.subr.bf16.mxu0 %v3650_v28  ;;  %4426 = vst [vmem:[#allocation67_spill] sm:$0xff] %v3680_v30  ;;  %v3687_v27 = vld [vmem:[%s4186_s8 + $0x1d0] ss:$8 sps:$4 sm:$0xff]   ;;  %v3692_v28 = vld [vmem:[%s4186_s8 + $0xc4] ss:$8 sps:$4 sm:$0xff]  }
 0x23e   :  { %4427 = vst [vmem:[#allocation68_spill] sm:$0xff] %v3687_v27  ;;  %4428 = vst [vmem:[#allocation69_spill] sm:$0xff] %v3692_v28 }
 0x240   :  { %1695 = vmatpush2.bf16.msra.mxu1 %v3655_v24  ;;  %1736 = vmatpush2.bf16.msra.mxu0 %v3660_v29  ;;  %v3698_v24 = vld [vmem:[%s4186_s8 + $0x1c4] ss:$8 sps:$4 sm:$0xff]   ;;  %v3716_v29 = vld [vmem:[%s4186_s8 + $0xb4] ss:$8 sps:$4 sm:$0xff]  }
 0x241   :  { %1696 = vmatprep.subr.bf16.mxu1 %v3666_v31  ;;  %1737 = vmatprep.subr.bf16.mxu0 %v3673_v37  ;;  %4429 = vst [vmem:[#allocation70_spill] sm:$0xff] %v3698_v24  ;;  %v3704_v31 = vld [vmem:[%s4186_s8 + $0xc0] ss:$8 sps:$4 sm:$0xff]   ;;  %4432 = vst [vmem:[#allocation73_spill] sm:$0xff] %v3716_v29 }
 0x242   :  { %4430 = vst [vmem:[#allocation71_spill] sm:$0xff] %v3704_v31  ;;  %v3711_v37 = vld [vmem:[%s4186_s8 + $0x1c0] ss:$8 sps:$4 sm:$0xff]  }
 0x243   :  { %4431 = vst [vmem:[#allocation72_spill] sm:$0xff] %v3711_v37 }
 0x244   :  { %1697 = vmatpush2.bf16.msra.mxu1 %v3680_v30  ;;  %1738 = vmatpush2.bf16.msra.mxu0 %v3687_v27  ;;  %v3722_v30 = vld [vmem:[%s4186_s8 + $0x1b4] ss:$8 sps:$4 sm:$0xff]   ;;  %v3740_v27 = vld [vmem:[%s4186_s8 + $0xa4] ss:$8 sps:$4 sm:$0xff]  }
 0x245   :  { %1698 = vmatprep.subr.bf16.mxu1 %v3692_v28  ;;  %1739 = vmatprep.subr.bf16.mxu0 %v3698_v24  ;;  %4433 = vst [vmem:[#allocation74_spill] sm:$0xff] %v3722_v30  ;;  %v3728_v28 = vld [vmem:[%s4186_s8 + $0xb0] ss:$8 sps:$4 sm:$0xff]   ;;  %4436 = vst [vmem:[#allocation77_spill] sm:$0xff] %v3740_v27 }
 0x246   :  { %4434 = vst [vmem:[#allocation75_spill] sm:$0xff] %v3728_v28  ;;  %v3735_v24 = vld [vmem:[%s4186_s8 + $0x1b0] ss:$8 sps:$4 sm:$0xff]  }
 0x247   :  { %4435 = vst [vmem:[#allocation76_spill] sm:$0xff] %v3735_v24 }
 0x248   :  { %1699 = vmatpush2.bf16.msra.mxu1 %v3704_v31  ;;  %1740 = vmatpush2.bf16.msra.mxu0 %v3711_v37  ;;  %v3746_v31 = vld [vmem:[%s4186_s8 + $0x1a4] ss:$8 sps:$4 sm:$0xff]  }
 0x249   :  { %1700 = vmatprep.subr.bf16.mxu1 %v3716_v29  ;;  %1741 = vmatprep.subr.bf16.mxu0 %v3722_v30  ;;  %4437 = vst [vmem:[#allocation78_spill] sm:$0xff] %v3746_v31  ;;  %v3752_v29 = vld [vmem:[%s4186_s8 + $0xa0] ss:$8 sps:$4 sm:$0xff]  }
 0x24a   :  { %4438 = vst [vmem:[#allocation79_spill] sm:$0xff] %v3752_v29  ;;  %v3759_v30 = vld [vmem:[%s4186_s8 + $0x1a0] ss:$8 sps:$4 sm:$0xff]  }
 0x24b   :  { %4439 = vst [vmem:[#allocation80_spill] sm:$0xff] %v3759_v30 }
 0x24c   :  { %1701 = vmatpush2.bf16.msra.mxu1 %v3728_v28  ;;  %1742 = vmatpush2.bf16.msra.mxu0 %v3735_v24  ;;  %v3766_v28 = vld [vmem:[%s4186_s8 + $0x94] ss:$8 sps:$4 sm:$0xff]  }
 0x24d   :  { %1702 = vmatprep.subr.bf16.mxu1 %v3740_v27  ;;  %1743 = vmatprep.subr.bf16.mxu0 %v3746_v31  ;;  %4440 = vst [vmem:[#allocation81_spill] sm:$0xff] %v3766_v28  ;;  %v3771_v24 = vld [vmem:[%s4186_s8 + $0x194] ss:$8 sps:$4 sm:$0xff]   ;;  %v3777_v27 = vld [vmem:[%s4186_s8 + $0x90] ss:$8 sps:$4 sm:$0xff]  }
 0x24e   :  { %4441 = vst [vmem:[#allocation82_spill] sm:$0xff] %v3771_v24  ;;  %4442 = vst [vmem:[#allocation83_spill] sm:$0xff] %v3777_v27  ;;  %v3795_v31 = vld [vmem:[%s4186_s8 + $0x184] ss:$8 sps:$4 sm:$0xff]  }
 0x24f   :  { %4445 = vst [vmem:[#allocation86_spill] sm:$0xff] %v3795_v31 }
 0x250   :  { %1703 = vmatpush2.bf16.msra.mxu1 %v3752_v29  ;;  %1744 = vmatpush2.bf16.msra.mxu0 %v3759_v30  ;;  %v3782_v29 = vld [vmem:[%s4186_s8 + $0x190] ss:$8 sps:$4 sm:$0xff]   ;;  %v3790_v30 = vld [vmem:[%s4186_s8 + $0x84] ss:$8 sps:$4 sm:$0xff]  }
 0x251   :  { %4443 = vst [vmem:[#allocation84_spill] sm:$0xff] %v3782_v29  ;;  %1704 = vmatprep.subr.bf16.mxu1 %v3766_v28  ;;  %1745 = vmatprep.subr.bf16.mxu0 %v3771_v24  ;;  %4444 = vst [vmem:[#allocation85_spill] sm:$0xff] %v3790_v30  ;;  %v3801_v28 = vld [vmem:[%s4186_s8 + $0x80] ss:$8 sps:$4 sm:$0xff]  }
 0x252   :  { %4446 = vst [vmem:[#allocation87_spill] sm:$0xff] %v3801_v28 }
 0x254   :  { %1705 = vmatpush2.bf16.msra.mxu1 %v3777_v27  ;;  %1746 = vmatpush2.bf16.msra.mxu0 %v3782_v29  ;;  %v3806_v27 = vld [vmem:[%s4186_s8 + $0x180] ss:$8 sps:$4 sm:$0xff]  }
 0x255   :  { %4447 = vst [vmem:[#allocation88_spill] sm:$0xff] %v3806_v27  ;;  %1706 = vmatprep.subr.bf16.mxu1 %v3790_v30  ;;  %1747 = vmatprep.subr.bf16.mxu0 %v3795_v31  ;;  %v529_v30 = vsub.s32 2, %v2917_v7 }
 0x258   :  { %1707 = vmatpush2.bf16.msra.mxu1 %v3801_v28  ;;  %1748 = vmatpush2.bf16.msra.mxu0 %v3806_v27  ;;  %v517_v28 = vld [vmem:[%s4187_s7] sm:$0xf]  ;;  %v533_v27 = vsub.s32 3, %v2917_v7 }
 0x259   :  { %1780 = vmatprep.subr.bf16.mxu1 %v3038_v25  ;;  %1821 = vmatprep.subr.bf16.mxu0 %v3044_v26  ;;  %v522_v25 = vrot.slane %v517_v28, %v2920_v10  ;;  %v530_v31 = vrot.slane %v517_v28, %v529_v30  ;;  %v526_v26 = vrot.slane %v517_v28, %v2926_v13 }
 0x25a   :  { %v534_v19 = vrot.slane %v517_v28, %v533_v27 }
 0x29b   :  { %v893_v29 = vpop.f32.mrf.mxu1  ;;  %v934_v24 = vpop.f32.mrf.mxu0 }
 0x29c   :  { %v3821_v18 = vadd.f32 %v893_v29, %v522_v25 }
 0x29d   :  { %v895_v37 = vpop.f32.mrf.mxu1  ;;  %v936_v34 = vpop.f32.mrf.mxu0 }
 0x29e   :  { %v3827_v17 = vadd.f32 %v936_v34, %v534_v19 }
 0x29f   :  { %v897_v23 = vpop.f32.mrf.mxu1  ;;  %v938_v22 = vpop.f32.mrf.mxu0 }
 0x2a0   :  { %v3823_v23 = vadd.f32 %v934_v24, %v530_v31  ;;  %v3825_v22 = vadd.f32 %v895_v37, %v526_v26 }
 0x2a1   :  { %v898_v21 = vpop.f32.mrf.mxu1  ;;  %v939_v20 = vpop.f32.mrf.mxu0 }
 0x2db   :  { %v1300_v21 = vpop.f32.mrf.mxu1  ;;  %v1341_v20 = vpop.f32.mrf.mxu0 }
 0x2dc   :  { %v1348_v16 = vadd.f32 %v1300_v21, %v3821_v18  ;;  %v1350_v7 = vadd.f32 %v1341_v20, %v3823_v23 }
 0x2dd   :  { %v1302_v15 = vpop.f32.mrf.mxu1  ;;  %v1343_v10 = vpop.f32.mrf.mxu0 }
 0x2de   :  { %v1349_v30 = vadd.f32 %v1302_v15, %v3825_v22  ;;  %v1351_v27 = vadd.f32 %v1343_v10, %v3827_v17  ;;  %v1352_v25 = vpack.c.bf16 %v1348_v16, %v1348_v16  ;;  %v1354_v13 = vpack.c.bf16 %v1350_v7, %v1350_v7  ;;  %v4448_v10 = vld [vmem:[#allocation5_spill] sm:$0xff] }
 0x2df   :  { %v1304_v28 = vpop.f32.mrf.mxu1  ;;  %v1345_v29 = vpop.f32.mrf.mxu0 }
 0x2e0   :  { %v1353_v31 = vpack.c.bf16 %v1349_v30, %v1349_v30  ;;  %v1355_v24 = vpack.c.bf16 %v1351_v27, %v1351_v27 }
 0x2e1   :  { %v1305_v37 = vpop.f32.mrf.mxu1  ;;  %v1346_v26 = vpop.f32.mrf.mxu0 }
 0x2e2   :  { %1708 = vmatprep.mubr.bf16.mxu1 %v1353_v31  ;;  %1749 = vmatprep.mubr.bf16.mxu0 %v1355_v24  ;;  %v4472_v31 = vld [vmem:[#allocation4_spill] sm:$0xff] }
 0x2e3   :  { %1709 = vmatmul.mubr.bf16.vlgmr.msra.gmra.mxu1 %v1352_v25  ;;  %1750 = vmatmul.mubr.bf16.vlgmr.msra.gmra.mxu0 %v1354_v13  ;;  %v4449_v13 = vld [vmem:[#allocation6_spill] sm:$0xff] }
 0x2e4   :  { %1781 = vmatpush1.bf16.msra.mxu1 %v3057_v32  ;;  %1822 = vmatpush1.bf16.msra.mxu0 %v3062_v33  ;;  %v4450_v32 = vld [vmem:[#allocation7_spill] sm:$0xff]  ;;  %v4451_v33 = vld [vmem:[#allocation8_spill] sm:$0xff] }
 0x2e5   :  { %1782 = vmatprep.subr.bf16.mxu1 %v3067_v35  ;;  %1823 = vmatprep.subr.bf16.mxu0 %v3072_v36  ;;  %v4452_v35 = vld [vmem:[#allocation9_spill] sm:$0xff]  ;;  %v4453_v36 = vld [vmem:[#allocation10_spill] sm:$0xff] }
 0x2e8   :  { %1783 = vmatpush1.bf16.msra.mxu1 %v3079_v38  ;;  %1824 = vmatpush1.bf16.msra.mxu0 %v3084_v39  ;;  %v4454_v38 = vld [vmem:[#allocation11_spill] sm:$0xff]  ;;  %v4455_v39 = vld [vmem:[#allocation12_spill] sm:$0xff] }
 0x2e9   :  { %1784 = vmatprep.subr.bf16.mxu1 %v3091_v40  ;;  %1825 = vmatprep.subr.bf16.mxu0 %v3096_v41  ;;  %v4456_v40 = vld [vmem:[#allocation13_spill] sm:$0xff]  ;;  %v4457_v41 = vld [vmem:[#allocation14_spill] sm:$0xff] }
 0x2ec   :  { %1785 = vmatpush1.bf16.msra.mxu1 %v3103_v42  ;;  %1826 = vmatpush1.bf16.msra.mxu0 %v3108_v43  ;;  %v4458_v42 = vld [vmem:[#allocation15_spill] sm:$0xff]  ;;  %v4459_v43 = vld [vmem:[#allocation16_spill] sm:$0xff] }
 0x2ed   :  { %1786 = vmatprep.subr.bf16.mxu1 %v3115_v44  ;;  %1827 = vmatprep.subr.bf16.mxu0 %v3120_v45  ;;  %v4460_v44 = vld [vmem:[#allocation17_spill] sm:$0xff]  ;;  %v4461_v45 = vld [vmem:[#allocation18_spill] sm:$0xff] }
 0x2f0   :  { %1787 = vmatpush1.bf16.msra.mxu1 %v3127_v46  ;;  %1828 = vmatpush1.bf16.msra.mxu0 %v3132_v47  ;;  %v4462_v46 = vld [vmem:[#allocation19_spill] sm:$0xff]  ;;  %v4463_v47 = vld [vmem:[#allocation20_spill] sm:$0xff] }
 0x2f1   :  { %1788 = vmatprep.subr.bf16.mxu1 %v3139_v48  ;;  %1829 = vmatprep.subr.bf16.mxu0 %v3144_v49  ;;  %v4464_v48 = vld [vmem:[#allocation21_spill] sm:$0xff]  ;;  %v4465_v49 = vld [vmem:[#allocation22_spill] sm:$0xff] }
 0x2f4   :  { %1789 = vmatpush1.bf16.msra.mxu1 %v3151_v50  ;;  %1830 = vmatpush1.bf16.msra.mxu0 %v3156_v51  ;;  %v4466_v50 = vld [vmem:[#allocation23_spill] sm:$0xff]  ;;  %v4467_v51 = vld [vmem:[#allocation24_spill] sm:$0xff] }
 0x2f5   :  { %1790 = vmatprep.subr.bf16.mxu1 %v3163_v52  ;;  %1831 = vmatprep.subr.bf16.mxu0 %v3168_v53  ;;  %v4468_v52 = vld [vmem:[#allocation26_spill] sm:$0xff]  ;;  %v4469_v53 = vld [vmem:[#allocation28_spill] sm:$0xff] }
 0x2f8   :  { %1791 = vmatpush1.bf16.msra.mxu1 %v3175_v54  ;;  %1832 = vmatpush1.bf16.msra.mxu0 %v3180_v55  ;;  %v450_v54 = vld [vmem:[%s4188_s9] sm:$0x3] }
 0x2f9   :  { %1792 = vmatprep.subr.bf16.mxu1 %v3187_v56  ;;  %1833 = vmatprep.subr.bf16.mxu0 %v3192_v57  ;;  %v4470_v57 = vld [vmem:[#allocation2_spill] sm:$0xff] }
 0x2fc   :  { %1793 = vmatpush1.bf16.msra.mxu1 %v3199_v58  ;;  %1834 = vmatpush1.bf16.msra.mxu0 %v3204_v59  ;;  %v1767_v58 = vrot.slane %v450_v54, %v4470_v57  ;;  %v4471_v59 = vld [vmem:[#allocation3_spill] sm:$0xff]  ;;  %v4475_v57 = vld [vmem:[#allocation30_spill] sm:$0xff] }
 0x2fd   :  { %1794 = vmatprep.subr.bf16.mxu1 %v3211_v60  ;;  %1835 = vmatprep.subr.bf16.mxu0 %v3216_v61  ;;  %v1771_v15 = vrot.slane %v450_v54, %v4471_v59  ;;  %v4477_v59 = vld [vmem:[#allocation29_spill] sm:$0xff] }
 0x2ff   :  { %v3902_v27 = vcombine.low %v1767_v58, %v1771_v15  ;;  %v4476_v58 = vld [vmem:[#allocation32_spill] sm:$0xff]  ;;  %v4478_v15 = vld [vmem:[#allocation31_spill] sm:$0xff] }
 0x300   :  { %1795 = vmatpush1.bf16.msra.mxu1 %v3223_v62  ;;  %1836 = vmatpush1.bf16.msra.mxu0 %v3228_v63 }
 0x301   :  { %1796 = vmatprep.subr.bf16.mxu1 %v3235_v0  ;;  %1837 = vmatprep.subr.bf16.mxu0 %v3240_v1 }
 0x304   :  { %1797 = vmatpush2.bf16.msra.mxu1 %v3247_v2  ;;  %1838 = vmatpush2.bf16.msra.mxu0 %v3252_v3 }
 0x305   :  { %1798 = vmatprep.subr.bf16.mxu1 %v3259_v4  ;;  %1839 = vmatprep.subr.bf16.mxu0 %v3264_v5 }
 0x308   :  { %1799 = vmatpush2.bf16.msra.mxu1 %v3271_v6  ;;  %1840 = vmatpush2.bf16.msra.mxu0 %v3276_v8 }
 0x309   :  { %1800 = vmatprep.subr.bf16.mxu1 %v3283_v9  ;;  %1841 = vmatprep.subr.bf16.mxu0 %v3288_v11 }
 0x30c   :  { %1801 = vmatpush2.bf16.msra.mxu1 %v3295_v12  ;;  %1842 = vmatpush2.bf16.msra.mxu0 %v3300_v14 }
 0x30d   :  { %1802 = vmatprep.subr.bf16.mxu1 %v4448_v10  ;;  %1843 = vmatprep.subr.bf16.mxu0 %v4449_v13 }
 0x310   :  { %1803 = vmatpush2.bf16.msra.mxu1 %v4450_v32  ;;  %1844 = vmatpush2.bf16.msra.mxu0 %v4451_v33 }
 0x311   :  { %1804 = vmatprep.subr.bf16.mxu1 %v4452_v35  ;;  %1845 = vmatprep.subr.bf16.mxu0 %v4453_v36 }
 0x314   :  { %1805 = vmatpush2.bf16.msra.mxu1 %v4454_v38  ;;  %1846 = vmatpush2.bf16.msra.mxu0 %v4455_v39 }
 0x315   :  { %1806 = vmatprep.subr.bf16.mxu1 %v4456_v40  ;;  %1847 = vmatprep.subr.bf16.mxu0 %v4457_v41 }
 0x318   :  { %1807 = vmatpush2.bf16.msra.mxu1 %v4458_v42  ;;  %1848 = vmatpush2.bf16.msra.mxu0 %v4459_v43 }
 0x319   :  { %1808 = vmatprep.subr.bf16.mxu1 %v4460_v44  ;;  %1849 = vmatprep.subr.bf16.mxu0 %v4461_v45 }
 0x31c   :  { %1809 = vmatpush2.bf16.msra.mxu1 %v4462_v46  ;;  %1850 = vmatpush2.bf16.msra.mxu0 %v4463_v47 }
 0x31d   :  { %1810 = vmatprep.subr.bf16.mxu1 %v4464_v48  ;;  %1851 = vmatprep.subr.bf16.mxu0 %v4465_v49 }
 0x320   :  { %1811 = vmatpush2.bf16.msra.mxu1 %v4466_v50  ;;  %1852 = vmatpush2.bf16.msra.mxu0 %v4467_v51 }
 0x321   :  { %1870 = vmatprep.subr.bf16.mxu1 %v4468_v52  ;;  %1911 = vmatprep.subr.bf16.mxu0 %v4469_v53 }
 0x3a3   :  { %v1710_v55 = vpop.f32.mrf.mxu1  ;;  %v1751_v56 = vpop.f32.mrf.mxu0 }
 0x3a4   :  { %v1752_v34 = vadd.f32 %v1751_v56, %v1710_v55  ;;  %v4473_v55 = vld [vmem:[#allocation25_spill] sm:$0xff]  ;;  %v4474_v56 = vld [vmem:[#allocation27_spill] sm:$0xff] }
 0x3a5   :  { %v1712_v16 = vpop.f32.mrf.mxu1  ;;  %v1753_v19 = vpop.f32.mrf.mxu0 }
 0x3a6   :  { %v1754_v21 = vadd.f32 %v1753_v19, %v1712_v16  ;;  %v4479_v16 = vld [vmem:[#allocation33_spill] sm:$0xff]  ;;  %v4480_v19 = vld [vmem:[#allocation35_spill] sm:$0xff] }
 0x3a7   :  { %v1714_v20 = vpop.f32.mrf.mxu1  ;;  %v1755_v7 = vpop.f32.mrf.mxu0 }
 0x3a8   :  { %v1760_v30 = vcombine.low %v1752_v34, %v1754_v21  ;;  %v4481_v34 = vld [vmem:[#allocation34_spill] sm:$0xff]  ;;  %v4482_v21 = vld [vmem:[#allocation36_spill] sm:$0xff]  ;;  %v4483_v20 = vld [vmem:[#allocation37_spill] sm:$0xff] }
 0x3a9   :  { %v1715_v28 = vpop.f32.mrf.mxu1  ;;  %v1756_v29 = vpop.f32.mrf.mxu0  ;;  %v4484_v7 = vld [vmem:[#allocation38_spill] sm:$0xff] }
 0x3aa   :  { %v1762_v24 = vadd.f32 %v1760_v30, %v4472_v31  ;;  %v4485_v30 = vld [vmem:[#allocation39_spill] sm:$0xff]  ;;  %v4486_v28 = vld [vmem:[#allocation40_spill] sm:$0xff]  ;;  %v4487_v29 = vld [vmem:[#allocation41_spill] sm:$0xff] }
 0x3ab   :  { %v4488_v31 = vld [vmem:[#allocation42_spill] sm:$0xff] }
 0x3ac   :  { %v3906_v25 = vadd.f32 %v3902_v27, %v1762_v24  ;;  %v4489_v24 = vld [vmem:[#allocation43_spill] sm:$0xff] }
 0x3ae   :  { %v1776_v37 = vcombine.high %v3906_v25, %v3906_v25  ;;  %v1778_v54 = vpack.c.bf16 %v3906_v25, %v3906_v25 }
 0x3b0   :  { %v1779_v26 = vpack.c.bf16 %v1776_v37, %v1776_v37  ;;  %v4490_v37 = vld [vmem:[#allocation44_spill] sm:$0xff] }
 0x3b2   :  { %1812 = vmatprep.mubr.bf16.mxu1 %v1779_v26  ;;  %1853 = vmatprep.mubr.bf16.mxu0 %v1779_v26  ;;  %v4491_v26 = vld [vmem:[#allocation45_spill] sm:$0xff] }
 0x3b3   :  { %1813 = vmatmul.mubr.bf16.vlgmr.msra.gmra.mxu1 %v1778_v54  ;;  %1854 = vmatmul.mubr.bf16.vlgmr.msra.gmra.mxu0 %v1778_v54  ;;  %v4492_v54 = vld [vmem:[#allocation46_spill] sm:$0xff] }
 0x3b4   :  { %1871 = vmatpush1.bf16.msra.mxu1 %v4473_v55  ;;  %1912 = vmatpush1.bf16.msra.mxu0 %v4474_v56 }
 0x3b5   :  { %1872 = vmatprep.subr.bf16.mxu1 %v4475_v57  ;;  %1913 = vmatprep.subr.bf16.mxu0 %v4476_v58 }
 0x3b8   :  { %1873 = vmatpush1.bf16.msra.mxu1 %v4477_v59  ;;  %1914 = vmatpush1.bf16.msra.mxu0 %v4478_v15 }
 0x3b9   :  { %1874 = vmatprep.subr.bf16.mxu1 %v4479_v16  ;;  %1915 = vmatprep.subr.bf16.mxu0 %v4480_v19 }
 0x3bc   :  { %1875 = vmatpush1.bf16.msra.mxu1 %v4481_v34  ;;  %1916 = vmatpush1.bf16.msra.mxu0 %v4482_v21  ;;  %v4493_v21 = vld [vmem:[#allocation47_spill] sm:$0xff] }
 0x3bd   :  { %1876 = vmatprep.subr.bf16.mxu1 %v4483_v20  ;;  %1917 = vmatprep.subr.bf16.mxu0 %v4484_v7  ;;  %v4494_v20 = vld [vmem:[#allocation48_spill] sm:$0xff]  ;;  %v4495_v7 = vld [vmem:[#allocation49_spill] sm:$0xff] }
 0x3c0   :  { %1877 = vmatpush1.bf16.msra.mxu1 %v4485_v30  ;;  %1918 = vmatpush1.bf16.msra.mxu0 %v4486_v28  ;;  %v4496_v30 = vld [vmem:[#allocation50_spill] sm:$0xff]  ;;  %v4497_v28 = vld [vmem:[#allocation51_spill] sm:$0xff] }
 0x3c1   :  { %1878 = vmatprep.subr.bf16.mxu1 %v4487_v29  ;;  %1919 = vmatprep.subr.bf16.mxu0 %v4488_v31  ;;  %v4498_v29 = vld [vmem:[#allocation52_spill] sm:$0xff]  ;;  %v4499_v31 = vld [vmem:[#allocation53_spill] sm:$0xff] }
 0x3c4   :  { %1879 = vmatpush1.bf16.msra.mxu1 %v4489_v24  ;;  %1920 = vmatpush1.bf16.msra.mxu0 %v4490_v37  ;;  %v4500_v24 = vld [vmem:[#allocation54_spill] sm:$0xff]  ;;  %v4501_v37 = vld [vmem:[#allocation55_spill] sm:$0xff] }
 0x3c5   :  { %1880 = vmatprep.subr.bf16.mxu1 %v4491_v26  ;;  %1921 = vmatprep.subr.bf16.mxu0 %v4492_v54  ;;  %v4502_v26 = vld [vmem:[#allocation56_spill] sm:$0xff]  ;;  %v4503_v54 = vld [vmem:[#allocation57_spill] sm:$0xff] }
 0x3c8   :  { %1881 = vmatpush1.bf16.msra.mxu1 %v4493_v21  ;;  %1922 = vmatpush1.bf16.msra.mxu0 %v4494_v20  ;;  %v4504_v21 = vld [vmem:[#allocation58_spill] sm:$0xff]  ;;  %v4505_v20 = vld [vmem:[#allocation59_spill] sm:$0xff] }
 0x3c9   :  { %1882 = vmatprep.subr.bf16.mxu1 %v4495_v7  ;;  %1923 = vmatprep.subr.bf16.mxu0 %v4496_v30  ;;  %v4506_v7 = vld [vmem:[#allocation60_spill] sm:$0xff]  ;;  %v4507_v30 = vld [vmem:[#allocation61_spill] sm:$0xff] }
 0x3cc   :  { %1883 = vmatpush1.bf16.msra.mxu1 %v4497_v28  ;;  %1924 = vmatpush1.bf16.msra.mxu0 %v4498_v29  ;;  %v4508_v28 = vld [vmem:[#allocation62_spill] sm:$0xff]  ;;  %v4509_v29 = vld [vmem:[#allocation63_spill] sm:$0xff] }
 0x3cd   :  { %1884 = vmatprep.subr.bf16.mxu1 %v4499_v31  ;;  %1925 = vmatprep.subr.bf16.mxu0 %v4500_v24  ;;  %v4510_v31 = vld [vmem:[#allocation64_spill] sm:$0xff]  ;;  %v4511_v24 = vld [vmem:[#allocation65_spill] sm:$0xff] }
 0x3d0   :  { %1885 = vmatpush1.bf16.msra.mxu1 %v4501_v37  ;;  %1926 = vmatpush1.bf16.msra.mxu0 %v4502_v26  ;;  %v4512_v37 = vld [vmem:[#allocation66_spill] sm:$0xff]  ;;  %v4513_v26 = vld [vmem:[#allocation67_spill] sm:$0xff] }
 0x3d1   :  { %1886 = vmatprep.subr.bf16.mxu1 %v4503_v54  ;;  %1927 = vmatprep.subr.bf16.mxu0 %v4504_v21  ;;  %v4514_v54 = vld [vmem:[#allocation68_spill] sm:$0xff]  ;;  %v4515_v21 = vld [vmem:[#allocation69_spill] sm:$0xff] }
 0x3d4   :  { %1887 = vmatpush2.bf16.msra.mxu1 %v4505_v20  ;;  %1928 = vmatpush2.bf16.msra.mxu0 %v4506_v7  ;;  %v4516_v20 = vld [vmem:[#allocation70_spill] sm:$0xff]  ;;  %v4517_v7 = vld [vmem:[#allocation71_spill] sm:$0xff] }
 0x3d5   :  { %1888 = vmatprep.subr.bf16.mxu1 %v4507_v30  ;;  %1929 = vmatprep.subr.bf16.mxu0 %v4508_v28  ;;  %v4518_v30 = vld [vmem:[#allocation72_spill] sm:$0xff]  ;;  %v4519_v28 = vld [vmem:[#allocation73_spill] sm:$0xff] }
 0x3d8   :  { %1889 = vmatpush2.bf16.msra.mxu1 %v4509_v29  ;;  %1930 = vmatpush2.bf16.msra.mxu0 %v4510_v31  ;;  %v4520_v29 = vld [vmem:[#allocation74_spill] sm:$0xff]  ;;  %v4521_v31 = vld [vmem:[#allocation75_spill] sm:$0xff] }
 0x3d9   :  { %1890 = vmatprep.subr.bf16.mxu1 %v4511_v24  ;;  %1931 = vmatprep.subr.bf16.mxu0 %v4512_v37  ;;  %v4522_v24 = vld [vmem:[#allocation76_spill] sm:$0xff]  ;;  %v4523_v37 = vld [vmem:[#allocation77_spill] sm:$0xff] }
 0x3dc   :  { %1891 = vmatpush2.bf16.msra.mxu1 %v4513_v26  ;;  %1932 = vmatpush2.bf16.msra.mxu0 %v4514_v54  ;;  %v4524_v26 = vld [vmem:[#allocation78_spill] sm:$0xff]  ;;  %v4525_v54 = vld [vmem:[#allocation79_spill] sm:$0xff] }
 0x3dd   :  { %1892 = vmatprep.subr.bf16.mxu1 %v4515_v21  ;;  %1933 = vmatprep.subr.bf16.mxu0 %v4516_v20  ;;  %v4526_v21 = vld [vmem:[#allocation80_spill] sm:$0xff]  ;;  %v4527_v20 = vld [vmem:[#allocation81_spill] sm:$0xff] }
 0x3e0   :  { %1893 = vmatpush2.bf16.msra.mxu1 %v4517_v7  ;;  %1934 = vmatpush2.bf16.msra.mxu0 %v4518_v30  ;;  %v4528_v7 = vld [vmem:[#allocation82_spill] sm:$0xff]  ;;  %v4529_v30 = vld [vmem:[#allocation83_spill] sm:$0xff] }
 0x3e1   :  { %1894 = vmatprep.subr.bf16.mxu1 %v4519_v28  ;;  %1935 = vmatprep.subr.bf16.mxu0 %v4520_v29  ;;  %v4530_v28 = vld [vmem:[#allocation84_spill] sm:$0xff]  ;;  %v4531_v29 = vld [vmem:[#allocation85_spill] sm:$0xff] }
 0x3e4   :  { %1895 = vmatpush2.bf16.msra.mxu1 %v4521_v31  ;;  %1936 = vmatpush2.bf16.msra.mxu0 %v4522_v24  ;;  %v4532_v31 = vld [vmem:[#allocation86_spill] sm:$0xff]  ;;  %v4533_v24 = vld [vmem:[#allocation87_spill] sm:$0xff] }
 0x3e5   :  { %1896 = vmatprep.subr.bf16.mxu1 %v4523_v37  ;;  %1937 = vmatprep.subr.bf16.mxu0 %v4524_v26  ;;  %v4534_v37 = vld [vmem:[#allocation88_spill] sm:$0xff] }
 0x3e8   :  { %1897 = vmatpush2.bf16.msra.mxu1 %v4525_v54  ;;  %1938 = vmatpush2.bf16.msra.mxu0 %v4526_v21  ;;  %v2670_v21 = vld [vmem:[%s4184_s6 + $0xe4] ss:$16 sps:$4 sm:$0xff]  }
 0x3e9   :  { %1898 = vmatprep.subr.bf16.mxu1 %v4527_v20  ;;  %1939 = vmatprep.subr.bf16.mxu0 %v4528_v7  ;;  %v2671_v7 = vld [vmem:[%s4184_s6 + $0xec] ss:$16 sps:$4 sm:$0xff]  }
 0x3ec   :  { %1899 = vmatpush2.bf16.msra.mxu1 %v4529_v30  ;;  %1940 = vmatpush2.bf16.msra.mxu0 %v4530_v28 }
 0x3ed   :  { %1900 = vmatprep.subr.bf16.mxu1 %v4531_v29  ;;  %1941 = vmatprep.subr.bf16.mxu0 %v4532_v31 }
 0x3f0   :  { %1901 = vmatpush2.bf16.msra.mxu1 %v4533_v24  ;;  %1942 = vmatpush2.bf16.msra.mxu0 %v4534_v37 }
 0x3f1   :  { %1963 = vmatprep.subr.bf16.mxu1 %v2670_v21  ;;  %2004 = vmatprep.subr.bf16.mxu0 %v2671_v7 }
 0x473   :  { %v1814_v30 = vpop.f32.mrf.mxu1  ;;  %v1855_v28 = vpop.f32.mrf.mxu0 }
 0x474   :  { %v1862_v29 = vadd.f32 %v1814_v30, %v3821_v18  ;;  %v1864_v31 = vadd.f32 %v1855_v28, %v3823_v23  ;;  %v2672_v30 = vld [vmem:[%s4184_s6 + $0xe0] ss:$16 sps:$4 sm:$0xff]   ;;  %v2679_v28 = vld [vmem:[%s4184_s6 + $0xac] ss:$16 sps:$4 sm:$0xff]  }
 0x475   :  { %v1816_v20 = vpop.f32.mrf.mxu1  ;;  %v1857_v24 = vpop.f32.mrf.mxu0 }
 0x476   :  { %v1863_v37 = vadd.f32 %v1816_v20, %v3825_v22  ;;  %v1865_v54 = vadd.f32 %v1857_v24, %v3827_v17  ;;  %v1866_v16 = vpack.c.bf16 %v1862_v29, %v1862_v29  ;;  %v1868_v15 = vpack.c.bf16 %v1864_v31, %v1864_v31  ;;  %v2673_v20 = vld [vmem:[%s4184_s6 + $0xe8] ss:$16 sps:$4 sm:$0xff]   ;;  %v2680_v29 = vld [vmem:[%s4184_s6 + $0xa0] ss:$16 sps:$4 sm:$0xff]   ;;  %v2682_v24 = vld [vmem:[%s4184_s6 + $0x84] ss:$16 sps:$4 sm:$0xff]  }
 0x477   :  { %v1818_v26 = vpop.f32.mrf.mxu1  ;;  %v1859_v34 = vpop.f32.mrf.mxu0  ;;  %v2681_v31 = vld [vmem:[%s4184_s6 + $0xa8] ss:$16 sps:$4 sm:$0xff]  }
 0x478   :  { %v1867_v21 = vpack.c.bf16 %v1863_v37, %v1863_v37  ;;  %v1869_v19 = vpack.c.bf16 %v1865_v54, %v1865_v54  ;;  %v2674_v34 = vld [vmem:[%s4184_s6 + $0xc4] ss:$16 sps:$4 sm:$0xff]   ;;  %v2683_v37 = vld [vmem:[%s4184_s6 + $0x8c] ss:$16 sps:$4 sm:$0xff]   ;;  %v2684_v26 = vld [vmem:[%s4184_s6 + $0x80] ss:$16 sps:$4 sm:$0xff]  }
 0x479   :  { %v1819_v59 = vpop.f32.mrf.mxu1  ;;  %v1860_v7 = vpop.f32.mrf.mxu0  ;;  %v2685_v54 = vld [vmem:[%s4184_s6 + $0x88] ss:$16 sps:$4 sm:$0xff]  }
 0x47a   :  { %1902 = vmatprep.mubr.bf16.mxu1 %v1867_v21  ;;  %1943 = vmatprep.mubr.bf16.mxu0 %v1869_v19  ;;  %v2675_v59 = vld [vmem:[%s4184_s6 + $0xcc] ss:$16 sps:$4 sm:$0xff]   ;;  %v2678_v19 = vld [vmem:[%s4184_s6 + $0xa4] ss:$16 sps:$4 sm:$0xff]  }
 0x47b   :  { %1903 = vmatmul.mubr.bf16.vlgmr.msra.gmra.mxu1 %v1866_v16  ;;  %1944 = vmatmul.mubr.bf16.vlgmr.msra.gmra.mxu0 %v1868_v15  ;;  %v2676_v15 = vld [vmem:[%s4184_s6 + $0xc0] ss:$16 sps:$4 sm:$0xff]   ;;  %v2677_v16 = vld [vmem:[%s4184_s6 + $0xc8] ss:$16 sps:$4 sm:$0xff]   ;;  %v2686_v21 = vld [vmem:[%s4184_s6 + $0x64] ss:$16 sps:$4 sm:$0xff]  }
 0x47c   :  { %1964 = vmatpush1.bf16.msra.mxu1 %v2672_v30  ;;  %2005 = vmatpush1.bf16.msra.mxu0 %v2673_v20  ;;  %v2687_v7 = vld [vmem:[%s4184_s6 + $0x6c] ss:$16 sps:$4 sm:$0xff]   ;;  %v2688_v30 = vld [vmem:[%s4184_s6 + $0x60] ss:$16 sps:$4 sm:$0xff]   ;;  %v2689_v20 = vld [vmem:[%s4184_s6 + $0x68] ss:$16 sps:$4 sm:$0xff]  }
 0x47d   :  { %1965 = vmatprep.subr.bf16.mxu1 %v2674_v34  ;;  %2006 = vmatprep.subr.bf16.mxu0 %v2675_v59  ;;  %v2690_v34 = vld [vmem:[%s4184_s6 + $0x44] ss:$16 sps:$4 sm:$0xff]   ;;  %v2691_v59 = vld [vmem:[%s4184_s6 + $0x4c] ss:$16 sps:$4 sm:$0xff]  }
 0x480   :  { %1966 = vmatpush1.bf16.msra.mxu1 %v2676_v15  ;;  %2007 = vmatpush1.bf16.msra.mxu0 %v2677_v16  ;;  %v2692_v15 = vld [vmem:[%s4184_s6 + $0x40] ss:$16 sps:$4 sm:$0xff]   ;;  %v2693_v16 = vld [vmem:[%s4184_s6 + $0x48] ss:$16 sps:$4 sm:$0xff]  }
 0x481   :  { %1967 = vmatprep.subr.bf16.mxu1 %v2678_v19  ;;  %2008 = vmatprep.subr.bf16.mxu0 %v2679_v28  ;;  %v2694_v19 = vld [vmem:[%s4184_s6 + $0x24] ss:$16 sps:$4 sm:$0xff]   ;;  %v2695_v28 = vld [vmem:[%s4184_s6 + $0x2c] ss:$16 sps:$4 sm:$0xff]  }
 0x484   :  { %1968 = vmatpush1.bf16.msra.mxu1 %v2680_v29  ;;  %2009 = vmatpush1.bf16.msra.mxu0 %v2681_v31  ;;  %v2696_v29 = vld [vmem:[%s4184_s6 + $0x20] ss:$16 sps:$4 sm:$0xff]   ;;  %v2697_v31 = vld [vmem:[%s4184_s6 + $0x28] ss:$16 sps:$4 sm:$0xff]  }
 0x485   :  { %1969 = vmatprep.subr.bf16.mxu1 %v2682_v24  ;;  %2010 = vmatprep.subr.bf16.mxu0 %v2683_v37  ;;  %v4562_v24 = vld [vmem:[#allocation58_spill] sm:$0xff]  ;;  %v4563_v37 = vld [vmem:[#allocation59_spill] sm:$0xff] }
 0x488   :  { %1970 = vmatpush1.bf16.msra.mxu1 %v2684_v26  ;;  %2011 = vmatpush1.bf16.msra.mxu0 %v2685_v54  ;;  %v4564_v26 = vld [vmem:[#allocation60_spill] sm:$0xff]  ;;  %v4565_v54 = vld [vmem:[#allocation61_spill] sm:$0xff] }
 0x489   :  { %1971 = vmatprep.subr.bf16.mxu1 %v2686_v21  ;;  %2012 = vmatprep.subr.bf16.mxu0 %v2687_v7  ;;  %v4566_v21 = vld [vmem:[#allocation62_spill] sm:$0xff]  ;;  %v4567_v7 = vld [vmem:[#allocation63_spill] sm:$0xff] }
 0x48c   :  { %1972 = vmatpush1.bf16.msra.mxu1 %v2688_v30  ;;  %2013 = vmatpush1.bf16.msra.mxu0 %v2689_v20  ;;  %v4568_v30 = vld [vmem:[#allocation64_spill] sm:$0xff]  ;;  %v4569_v20 = vld [vmem:[#allocation65_spill] sm:$0xff] }
 0x48d   :  { %1973 = vmatprep.subr.bf16.mxu1 %v2690_v34  ;;  %2014 = vmatprep.subr.bf16.mxu0 %v2691_v59  ;;  %v4570_v34 = vld [vmem:[#allocation66_spill] sm:$0xff]  ;;  %v4571_v59 = vld [vmem:[#allocation67_spill] sm:$0xff] }
 0x490   :  { %1974 = vmatpush1.bf16.msra.mxu1 %v2692_v15  ;;  %2015 = vmatpush1.bf16.msra.mxu0 %v2693_v16  ;;  %v4572_v15 = vld [vmem:[#allocation68_spill] sm:$0xff]  ;;  %v4573_v16 = vld [vmem:[#allocation69_spill] sm:$0xff] }
 0x491   :  { %1975 = vmatprep.subr.bf16.mxu1 %v2694_v19  ;;  %2016 = vmatprep.subr.bf16.mxu0 %v2695_v28  ;;  %v4574_v19 = vld [vmem:[#allocation70_spill] sm:$0xff]  ;;  %v4575_v28 = vld [vmem:[#allocation71_spill] sm:$0xff] }
 0x494   :  { %1976 = vmatpush1.bf16.msra.mxu1 %v2696_v29  ;;  %2017 = vmatpush1.bf16.msra.mxu0 %v2697_v31  ;;  %v4576_v29 = vld [vmem:[#allocation72_spill] sm:$0xff]  ;;  %v4577_v31 = vld [vmem:[#allocation73_spill] sm:$0xff] }
 0x495   :  { %1977 = vmatprep.subr.bf16.mxu1 %v3211_v60  ;;  %2018 = vmatprep.subr.bf16.mxu0 %v3216_v61 }
 0x498   :  { %1978 = vmatpush1.bf16.msra.mxu1 %v3223_v62  ;;  %2019 = vmatpush1.bf16.msra.mxu0 %v3228_v63 }
 0x499   :  { %1979 = vmatprep.subr.bf16.mxu1 %v3235_v0  ;;  %2020 = vmatprep.subr.bf16.mxu0 %v3240_v1 }
 0x49c   :  { %1980 = vmatpush2.bf16.msra.mxu1 %v3247_v2  ;;  %2021 = vmatpush2.bf16.msra.mxu0 %v3252_v3 }
 0x49d   :  { %1981 = vmatprep.subr.bf16.mxu1 %v3259_v4  ;;  %2022 = vmatprep.subr.bf16.mxu0 %v3264_v5 }
 0x4a0   :  { %1982 = vmatpush2.bf16.msra.mxu1 %v3271_v6  ;;  %2023 = vmatpush2.bf16.msra.mxu0 %v3276_v8 }
 0x4a1   :  { %1983 = vmatprep.subr.bf16.mxu1 %v3283_v9  ;;  %2024 = vmatprep.subr.bf16.mxu0 %v3288_v11 }
 0x4a4   :  { %1984 = vmatpush2.bf16.msra.mxu1 %v3295_v12  ;;  %2025 = vmatpush2.bf16.msra.mxu0 %v3300_v14 }
 0x4a5   :  { %1985 = vmatprep.subr.bf16.mxu1 %v4448_v10  ;;  %2026 = vmatprep.subr.bf16.mxu0 %v4449_v13  ;;  %v4535_v10 = vld [vmem:[#allocation29_spill] sm:$0xff]  ;;  %v4536_v13 = vld [vmem:[#allocation31_spill] sm:$0xff] }
 0x4a8   :  { %1986 = vmatpush2.bf16.msra.mxu1 %v4450_v32  ;;  %2027 = vmatpush2.bf16.msra.mxu0 %v4451_v33  ;;  %v4537_v32 = vld [vmem:[#allocation33_spill] sm:$0xff]  ;;  %v4538_v33 = vld [vmem:[#allocation35_spill] sm:$0xff] }
 0x4a9   :  { %1987 = vmatprep.subr.bf16.mxu1 %v4452_v35  ;;  %2028 = vmatprep.subr.bf16.mxu0 %v4453_v36  ;;  %v4539_v35 = vld [vmem:[#allocation34_spill] sm:$0xff]  ;;  %v4540_v36 = vld [vmem:[#allocation36_spill] sm:$0xff] }
 0x4ac   :  { %1988 = vmatpush2.bf16.msra.mxu1 %v4454_v38  ;;  %2029 = vmatpush2.bf16.msra.mxu0 %v4455_v39  ;;  %v4541_v38 = vld [vmem:[#allocation37_spill] sm:$0xff]  ;;  %v4542_v39 = vld [vmem:[#allocation38_spill] sm:$0xff] }
 0x4ad   :  { %1989 = vmatprep.subr.bf16.mxu1 %v4456_v40  ;;  %2030 = vmatprep.subr.bf16.mxu0 %v4457_v41  ;;  %v4543_v40 = vld [vmem:[#allocation39_spill] sm:$0xff]  ;;  %v4544_v41 = vld [vmem:[#allocation40_spill] sm:$0xff] }
 0x4b0   :  { %1990 = vmatpush2.bf16.msra.mxu1 %v4458_v42  ;;  %2031 = vmatpush2.bf16.msra.mxu0 %v4459_v43  ;;  %v4545_v42 = vld [vmem:[#allocation41_spill] sm:$0xff]  ;;  %v4546_v43 = vld [vmem:[#allocation42_spill] sm:$0xff] }
 0x4b1   :  { %1991 = vmatprep.subr.bf16.mxu1 %v4460_v44  ;;  %2032 = vmatprep.subr.bf16.mxu0 %v4461_v45  ;;  %v4547_v44 = vld [vmem:[#allocation43_spill] sm:$0xff]  ;;  %v4548_v45 = vld [vmem:[#allocation44_spill] sm:$0xff] }
 0x4b4   :  { %1992 = vmatpush2.bf16.msra.mxu1 %v4462_v46  ;;  %2033 = vmatpush2.bf16.msra.mxu0 %v4463_v47  ;;  %v4549_v46 = vld [vmem:[#allocation45_spill] sm:$0xff]  ;;  %v4550_v47 = vld [vmem:[#allocation46_spill] sm:$0xff] }
 0x4b5   :  { %1993 = vmatprep.subr.bf16.mxu1 %v4464_v48  ;;  %2034 = vmatprep.subr.bf16.mxu0 %v4465_v49  ;;  %v4551_v48 = vld [vmem:[#allocation47_spill] sm:$0xff]  ;;  %v4552_v49 = vld [vmem:[#allocation48_spill] sm:$0xff] }
 0x4b8   :  { %1994 = vmatpush2.bf16.msra.mxu1 %v4466_v50  ;;  %2035 = vmatpush2.bf16.msra.mxu0 %v4467_v51  ;;  %v4553_v50 = vld [vmem:[#allocation49_spill] sm:$0xff]  ;;  %v4554_v51 = vld [vmem:[#allocation50_spill] sm:$0xff] }
 0x4b9   :  { %2053 = vmatprep.subr.bf16.mxu1 %v4468_v52  ;;  %2094 = vmatprep.subr.bf16.mxu0 %v4469_v53  ;;  %v4555_v52 = vld [vmem:[#allocation51_spill] sm:$0xff]  ;;  %v4556_v53 = vld [vmem:[#allocation52_spill] sm:$0xff] }
 0x53b   :  { %v1904_v60 = vpop.f32.mrf.mxu1  ;;  %v1945_v61 = vpop.f32.mrf.mxu0 }
 0x53c   :  { %v1946_v0 = vadd.f32 %v1945_v61, %v1904_v60  ;;  %v4578_v60 = vld [vmem:[#allocation74_spill] sm:$0xff]  ;;  %v4579_v61 = vld [vmem:[#allocation75_spill] sm:$0xff] }
 0x53d   :  { %v1906_v62 = vpop.f32.mrf.mxu1  ;;  %v1947_v63 = vpop.f32.mrf.mxu0 }
 0x53e   :  { %v1948_v1 = vadd.f32 %v1947_v63, %v1906_v62  ;;  %v4580_v62 = vld [vmem:[#allocation76_spill] sm:$0xff]  ;;  %v4581_v63 = vld [vmem:[#allocation77_spill] sm:$0xff] }
 0x53f   :  { %v1908_v2 = vpop.f32.mrf.mxu1  ;;  %v1949_v3 = vpop.f32.mrf.mxu0 }
 0x540   :  { %v1954_v4 = vcombine.low %v1946_v0, %v1948_v1  ;;  %v4582_v0 = vld [vmem:[#allocation78_spill] sm:$0xff]  ;;  %v4583_v1 = vld [vmem:[#allocation79_spill] sm:$0xff]  ;;  %v4584_v2 = vld [vmem:[#allocation80_spill] sm:$0xff] }
 0x541   :  { %v1909_v5 = vpop.f32.mrf.mxu1  ;;  %v1950_v6 = vpop.f32.mrf.mxu0  ;;  %v4585_v3 = vld [vmem:[#allocation81_spill] sm:$0xff] }
 0x542   :  { %v1956_v8 = vadd.f32 %v1954_v4, %v3906_v25  ;;  %v4557_v25 = vld [vmem:[#allocation53_spill] sm:$0xff]  ;;  %v4586_v4 = vld [vmem:[#allocation82_spill] sm:$0xff]  ;;  %v4587_v5 = vld [vmem:[#allocation83_spill] sm:$0xff] }
 0x543   :  { %v4588_v6 = vld [vmem:[#allocation84_spill] sm:$0xff] }
 0x544   :  { %v4102_v9 = vadd.f32 %v1956_v8, %v3902_v27  ;;  %v4589_v8 = vld [vmem:[#allocation85_spill] sm:$0xff] }
 0x546   :  { %v1959_v11 = vcombine.high %v4102_v9, %v4102_v9  ;;  %v1961_v14 = vpack.c.bf16 %v4102_v9, %v4102_v9 }
 0x548   :  { %v1962_v12 = vpack.c.bf16 %v1959_v11, %v1959_v11  ;;  %v4590_v11 = vld [vmem:[#allocation86_spill] sm:$0xff] }
 0x54a   :  { %1995 = vmatprep.mubr.bf16.mxu1 %v1962_v12  ;;  %2036 = vmatprep.mubr.bf16.mxu0 %v1962_v12  ;;  %v4591_v12 = vld [vmem:[#allocation87_spill] sm:$0xff] }
 0x54b   :  { %1996 = vmatmul.mubr.bf16.vlgmr.msra.gmra.mxu1 %v1961_v14  ;;  %2037 = vmatmul.mubr.bf16.vlgmr.msra.gmra.mxu0 %v1961_v14  ;;  %v4592_v14 = vld [vmem:[#allocation88_spill] sm:$0xff] }
 0x54c   :  { %2054 = vmatpush1.bf16.msra.mxu1 %v4473_v55  ;;  %2095 = vmatpush1.bf16.msra.mxu0 %v4474_v56  ;;  %v4558_v55 = vld [vmem:[#allocation54_spill] sm:$0xff]  ;;  %v4559_v56 = vld [vmem:[#allocation55_spill] sm:$0xff] }
 0x54d   :  { %2055 = vmatprep.subr.bf16.mxu1 %v4475_v57  ;;  %2096 = vmatprep.subr.bf16.mxu0 %v4476_v58  ;;  %v4560_v57 = vld [vmem:[#allocation56_spill] sm:$0xff]  ;;  %v4561_v58 = vld [vmem:[#allocation57_spill] sm:$0xff] }
 0x550   :  { %2056 = vmatpush1.bf16.msra.mxu1 %v4535_v10  ;;  %2097 = vmatpush1.bf16.msra.mxu0 %v4536_v13 }
 0x551   :  { %2057 = vmatprep.subr.bf16.mxu1 %v4537_v32  ;;  %2098 = vmatprep.subr.bf16.mxu0 %v4538_v33 }
 0x554   :  { %2058 = vmatpush1.bf16.msra.mxu1 %v4539_v35  ;;  %2099 = vmatpush1.bf16.msra.mxu0 %v4540_v36 }
 0x555   :  { %2059 = vmatprep.subr.bf16.mxu1 %v4541_v38  ;;  %2100 = vmatprep.subr.bf16.mxu0 %v4542_v39 }
 0x558   :  { %2060 = vmatpush1.bf16.msra.mxu1 %v4543_v40  ;;  %2101 = vmatpush1.bf16.msra.mxu0 %v4544_v41 }
 0x559   :  { %2061 = vmatprep.subr.bf16.mxu1 %v4545_v42  ;;  %2102 = vmatprep.subr.bf16.mxu0 %v4546_v43 }
 0x55c   :  { %2062 = vmatpush1.bf16.msra.mxu1 %v4547_v44  ;;  %2103 = vmatpush1.bf16.msra.mxu0 %v4548_v45 }
 0x55d   :  { %2063 = vmatprep.subr.bf16.mxu1 %v4549_v46  ;;  %2104 = vmatprep.subr.bf16.mxu0 %v4550_v47 }
 0x560   :  { %2064 = vmatpush1.bf16.msra.mxu1 %v4551_v48  ;;  %2105 = vmatpush1.bf16.msra.mxu0 %v4552_v49 }
 0x561   :  { %2065 = vmatprep.subr.bf16.mxu1 %v4553_v50  ;;  %2106 = vmatprep.subr.bf16.mxu0 %v4554_v51 }
 0x564   :  { %2066 = vmatpush1.bf16.msra.mxu1 %v4555_v52  ;;  %2107 = vmatpush1.bf16.msra.mxu0 %v4556_v53 }
 0x565   :  { %2067 = vmatprep.subr.bf16.mxu1 %v4557_v25  ;;  %2108 = vmatprep.subr.bf16.mxu0 %v4558_v55 }
 0x568   :  { %2068 = vmatpush1.bf16.msra.mxu1 %v4559_v56  ;;  %2109 = vmatpush1.bf16.msra.mxu0 %v4560_v57 }
 0x569   :  { %2069 = vmatprep.subr.bf16.mxu1 %v4561_v58  ;;  %2110 = vmatprep.subr.bf16.mxu0 %v4562_v24 }
 0x56c   :  { %2070 = vmatpush2.bf16.msra.mxu1 %v4563_v37  ;;  %2111 = vmatpush2.bf16.msra.mxu0 %v4564_v26 }
 0x56d   :  { %2071 = vmatprep.subr.bf16.mxu1 %v4565_v54  ;;  %2112 = vmatprep.subr.bf16.mxu0 %v4566_v21 }
 0x570   :  { %2072 = vmatpush2.bf16.msra.mxu1 %v4567_v7  ;;  %2113 = vmatpush2.bf16.msra.mxu0 %v4568_v30 }
 0x571   :  { %2073 = vmatprep.subr.bf16.mxu1 %v4569_v20  ;;  %2114 = vmatprep.subr.bf16.mxu0 %v4570_v34 }
 0x574   :  { %2074 = vmatpush2.bf16.msra.mxu1 %v4571_v59  ;;  %2115 = vmatpush2.bf16.msra.mxu0 %v4572_v15 }
 0x575   :  { %2075 = vmatprep.subr.bf16.mxu1 %v4573_v16  ;;  %2116 = vmatprep.subr.bf16.mxu0 %v4574_v19 }
 0x578   :  { %2076 = vmatpush2.bf16.msra.mxu1 %v4575_v28  ;;  %2117 = vmatpush2.bf16.msra.mxu0 %v4576_v29 }
 0x579   :  { %2077 = vmatprep.subr.bf16.mxu1 %v4577_v31  ;;  %2118 = vmatprep.subr.bf16.mxu0 %v4578_v60 }
 0x57c   :  { %2078 = vmatpush2.bf16.msra.mxu1 %v4579_v61  ;;  %2119 = vmatpush2.bf16.msra.mxu0 %v4580_v62 }
 0x57d   :  { %2079 = vmatprep.subr.bf16.mxu1 %v4581_v63  ;;  %2120 = vmatprep.subr.bf16.mxu0 %v4582_v0 }
 0x580   :  { %2080 = vmatpush2.bf16.msra.mxu1 %v4583_v1  ;;  %2121 = vmatpush2.bf16.msra.mxu0 %v4584_v2 }
 0x581   :  { %2081 = vmatprep.subr.bf16.mxu1 %v4585_v3  ;;  %2122 = vmatprep.subr.bf16.mxu0 %v4586_v4 }
 0x584   :  { %2082 = vmatpush2.bf16.msra.mxu1 %v4587_v5  ;;  %2123 = vmatpush2.bf16.msra.mxu0 %v4588_v6 }
 0x585   :  { %2083 = vmatprep.subr.bf16.mxu1 %v4589_v8  ;;  %2124 = vmatprep.subr.bf16.mxu0 %v4590_v11 }
 0x588   :  { %2084 = vmatpush2.bf16.msra.mxu1 %v4591_v12  ;;  %2125 = vmatpush2.bf16.msra.mxu0 %v4592_v14 }
 0x60b   :  { %v1997_v10 = vpop.f32.mrf.mxu1  ;;  %v2038_v13 = vpop.f32.mrf.mxu0 }
 0x60c   :  { %v2045_v32 = vadd.f32 %v1997_v10, %v3821_v18  ;;  %v2047_v33 = vadd.f32 %v2038_v13, %v3823_v23 }
 0x60d   :  { %v1999_v35 = vpop.f32.mrf.mxu1  ;;  %v2040_v36 = vpop.f32.mrf.mxu0 }
 0x60e   :  { %v2046_v38 = vadd.f32 %v1999_v35, %v3825_v22  ;;  %v2048_v39 = vadd.f32 %v2040_v36, %v3827_v17  ;;  %v2049_v44 = vpack.c.bf16 %v2045_v32, %v2045_v32  ;;  %v2051_v45 = vpack.c.bf16 %v2047_v33, %v2047_v33 }
 0x60f   :  { %v2001_v40 = vpop.f32.mrf.mxu1  ;;  %v2042_v41 = vpop.f32.mrf.mxu0 }
 0x610   :  { %v2050_v42 = vpack.c.bf16 %v2046_v38, %v2046_v38  ;;  %v2052_v43 = vpack.c.bf16 %v2048_v39, %v2048_v39 }
 0x611   :  { %v2002_v46 = vpop.f32.mrf.mxu1  ;;  %v2043_v47 = vpop.f32.mrf.mxu0 }
 0x612   :  { %2085 = vmatprep.mubr.bf16.mxu1 %v2050_v42  ;;  %2126 = vmatprep.mubr.bf16.mxu0 %v2052_v43 }
 0x613   :  { %2086 = vmatmul.mubr.bf16.vlgmr.msra.gmra.mxu1 %v2049_v44  ;;  %2127 = vmatmul.mubr.bf16.vlgmr.msra.gmra.mxu0 %v2051_v45 }
 0x6d3   :  { %v2087_v18 = vpop.f32.mrf.mxu1  ;;  %v2128_v23 = vpop.f32.mrf.mxu0 }
 0x6d4   :  { %v2129_v50 = vadd.f32 %v2128_v23, %v2087_v18 }
 0x6d5   :  { %v2089_v48 = vpop.f32.mrf.mxu1  ;;  %v2130_v49 = vpop.f32.mrf.mxu0 }
 0x6d6   :  { %v2131_v22 = vadd.f32 %v2130_v49, %v2089_v48 }
 0x6d7   :  { %v2091_v51 = vpop.f32.mrf.mxu1  ;;  %v2132_v17 = vpop.f32.mrf.mxu0 }
 0x6d8   :  { %v2137_v52 = vcombine.low %v2129_v50, %v2131_v22 }
 0x6d9   :  { %v2092_v53 = vpop.f32.mrf.mxu1  ;;  %v2133_v25 = vpop.f32.mrf.mxu0 }
 0x6da   :  { %v2139_v55 = vadd.f32 %v2137_v52, %v4102_v9 }
 0x6dc   :  { %v2140_v56 = vadd.f32 %v2139_v55, %v3902_v27 }
 0x6de   :  { %2141 = vst [vmem:[%s4189_s10] sm:$0xff] %v2140_v56 }

</bundles_post_ra>
